<compile_context>
chip_gen: v6e
topology: v6e:2x2x1
jax: 0.10.0
libtpu: 0.0.40
codegen_flags: <defaults>
</compile_context>

<pallas_src>
import functools

import jax
import jax.numpy as jnp
from jax import lax
from jax.experimental import pallas as pl
from jax.experimental.pallas import tpu as pltpu


def _round_up(n, m):
    return ((n + m - 1) // m) * m


def _pad_to(a, shape):
    return jnp.pad(a, [(0, s - d) for d, s in zip(a.shape, shape)])


# ---------------------------------------------------------------------------
# Pallas kernel: input projection + full recurrence + Linear head, one call.
# ---------------------------------------------------------------------------
def gru_kernel(x_ref, wih_ref, bih_ref, whh_ref, bhh_ref, wlin_ref, blin_ref,
               out_ref, gi_ref, *, T, Bp, Hp):
    # 1) Input projection for ALL timesteps in one MXU matmul (f32 accumulate):
    #    gi[t*Bp:(t+1)*Bp, :] = x_t @ W_ih^T + b_ih   (time-major rows)
    gi_ref[...] = (jnp.dot(x_ref[...], wih_ref[...],
                           preferred_element_type=jnp.float32)
                   + bih_ref[...])

    # Resident recurrent operands, hoisted out of the serial loop.
    whh = whh_ref[...]          # (Hp, 3*Hp) bf16
    bhh = bhh_ref[...]          # (1, 3*Hp)  f32

    # 2) Serial recurrence: only h @ W_hh^T lives on the critical chain.
    def step(t, h):
        gi_t = gi_ref[pl.ds(t * Bp, Bp), :]                       # (Bp, 3*Hp)
        gh = jnp.dot(h.astype(jnp.bfloat16), whh,
                     preferred_element_type=jnp.float32) + bhh
        # Lane-aligned gate blocks (each gate owns its own Hp=128 lanes).
        r = jax.nn.sigmoid(gi_t[:, 0:Hp] + gh[:, 0:Hp])
        z = jax.nn.sigmoid(gi_t[:, Hp:2 * Hp] + gh[:, Hp:2 * Hp])
        n = jnp.tanh(gi_t[:, 2 * Hp:3 * Hp] + r * gh[:, 2 * Hp:3 * Hp])
        return (1.0 - z) * n + z * h

    h0 = jnp.zeros((Bp, Hp), jnp.float32)
    hT = lax.fori_loop(0, T, step, h0, unroll=True)

    # 3) Linear head on the final hidden state (lane-dense padded output).
    out_ref[...] = (jnp.dot(hT.astype(jnp.bfloat16), wlin_ref[...],
                            preferred_element_type=jnp.float32)
                    + blin_ref[...])


# ---------------------------------------------------------------------------
# Wrapper
# ---------------------------------------------------------------------------
@jax.jit
def gru_model_forward(x, params):
    """x: (B, T, I) float32  ->  (B, O) float32 (matches GRUModel.forward)."""
    w_ih, w_hh, b_ih, b_hh, w_lin, b_lin = params
    B, T, I = x.shape
    H = w_hh.shape[1]
    O = w_lin.shape[0]

    Hp = _round_up(H, 128)          # lane-aligned hidden size
    Op = _round_up(O, 128)          # lane-dense output
    Bp = _round_up(B, 8)            # sublane-aligned batch
    Ip = _round_up(I, 128)          # lane-aligned input size (contraction dim)

    # Gate-split, zero-padded, transposed weight layout, gate order [r|z|n].
    w_ih_g = w_ih.reshape(3, H, I)
    w_hh_g = w_hh.reshape(3, H, H)
    b_ih_g = b_ih.reshape(3, H)
    b_hh_g = b_hh.reshape(3, H)

    wih_t = jnp.concatenate([_pad_to(w_ih_g[g].T, (Ip, Hp)) for g in range(3)],
                            axis=1)                                   # (Ip, 3*Hp) f32
    whh_t = jnp.concatenate([_pad_to(w_hh_g[g].T, (Hp, Hp)) for g in range(3)],
                            axis=1).astype(jnp.bfloat16)              # (Hp, 3*Hp)
    bih = jnp.concatenate([_pad_to(b_ih_g[g], (Hp,)) for g in range(3)]
                          ).reshape(1, 3 * Hp)                        # (1, 3*Hp)
    bhh = jnp.concatenate([_pad_to(b_hh_g[g], (Hp,)) for g in range(3)]
                          ).reshape(1, 3 * Hp)                        # (1, 3*Hp)

    wlin_t = _pad_to(w_lin.T, (Hp, Op)).astype(jnp.bfloat16)          # (Hp, Op)
    blin = _pad_to(b_lin, (Op,)).reshape(1, Op)                       # (1, Op)

    # Time-major, zero-padded input, flattened to (T*Bp, Ip) so the kernel can
    # run the whole input projection as a single matmul.
    x_tm = _pad_to(jnp.transpose(x, (1, 0, 2)), (T, Bp, Ip))          # (T, Bp, Ip)
    x2d = x_tm.reshape(T * Bp, Ip)

    out_p = pl.pallas_call(
        functools.partial(gru_kernel, T=T, Bp=Bp, Hp=Hp),
        out_shape=jax.ShapeDtypeStruct((Bp, Op), jnp.float32),
        grid_spec=pltpu.PrefetchScalarGridSpec(
            num_scalar_prefetch=0,
            grid=(1,),
            in_specs=[
                pl.BlockSpec((T * Bp, Ip), lambda i: (0, 0)),          # x (time-major)
                pl.BlockSpec((Ip, 3 * Hp), lambda i: (0, 0)),          # W_ih^T (f32)
                pl.BlockSpec((1, 3 * Hp), lambda i: (0, 0)),           # b_ih
                pl.BlockSpec((Hp, 3 * Hp), lambda i: (0, 0)),          # W_hh^T (bf16)
                pl.BlockSpec((1, 3 * Hp), lambda i: (0, 0)),           # b_hh
                pl.BlockSpec((Hp, Op), lambda i: (0, 0)),              # W_lin^T (bf16)
                pl.BlockSpec((1, Op), lambda i: (0, 0)),               # b_lin
            ],
            out_specs=pl.BlockSpec((Bp, Op), lambda i: (0, 0)),
            scratch_shapes=[pltpu.VMEM((T * Bp, 3 * Hp), jnp.float32)],  # gi slab
        ),
        compiler_params=pltpu.CompilerParams(
            dimension_semantics=("arbitrary",)),
    )(x2d, wih_t, bih, whh_t, bhh, wlin_t, blin)

    return out_p[:B, :O]


# ---------------------------------------------------------------------------
# Pure-JAX f32 reference (same math as torch.nn.GRU + Linear on the last step)
# ---------------------------------------------------------------------------
def gru_model_reference(x, params):
    w_ih, w_hh, b_ih, b_hh, w_lin, b_lin = params
    B, T, I = x.shape
    H = w_hh.shape[1]

    def step(h, x_t):
        gi = x_t @ w_ih.T + b_ih
        gh = h @ w_hh.T + b_hh
        r = jax.nn.sigmoid(gi[:, :H] + gh[:, :H])
        z = jax.nn.sigmoid(gi[:, H:2 * H] + gh[:, H:2 * H])
        n = jnp.tanh(gi[:, 2 * H:] + r * gh[:, 2 * H:])
        return (1.0 - z) * n + z * h, None

    h0 = jnp.zeros((B, H), jnp.float32)
    h_last, _ = lax.scan(step, h0, jnp.transpose(x, (1, 0, 2)))
    return h_last @ w_lin.T + b_lin


# ---------------------------------------------------------------------------
# Deterministic parameter init (uniform(-1/sqrt(H), 1/sqrt(H)) like PyTorch)
# ---------------------------------------------------------------------------
def init_params(key, input_size, hidden_size, output_size):
    ks = jax.random.split(key, 6)
    k = 1.0 / jnp.sqrt(hidden_size)
    w_ih = jax.random.uniform(ks[0], (3 * hidden_size, input_size), jnp.float32, -k, k)
    w_hh = jax.random.uniform(ks[1], (3 * hidden_size, hidden_size), jnp.float32, -k, k)
    b_ih = jax.random.uniform(ks[2], (3 * hidden_size,), jnp.float32, -k, k)
    b_hh = jax.random.uniform(ks[3], (3 * hidden_size,), jnp.float32, -k, k)
    w_lin = jax.random.uniform(ks[4], (output_size, hidden_size), jnp.float32, -k, k)
    b_lin = jax.random.uniform(ks[5], (output_size,), jnp.float32, -k, k)
    return (w_ih, w_hh, b_ih, b_hh, w_lin, b_lin)


if __name__ == "__main__":
    INPUT_SIZE, HIDDEN_SIZE, OUTPUT_SIZE = 7, 32, 1
    BATCH, SEQ = 2, 8

    key = jax.random.PRNGKey(0)
    k_x, k_p = jax.random.split(key)
    x = jax.random.normal(k_x, (BATCH, SEQ, INPUT_SIZE), jnp.float32)
    params = init_params(k_p, INPUT_SIZE, HIDDEN_SIZE, OUTPUT_SIZE)

    out = gru_model_forward(x, params)
    out = jax.block_until_ready(out)

    ref = gru_model_reference(x, params)
    assert out.shape == (BATCH, OUTPUT_SIZE), out.shape
    # bf16 matmul operands on the recurrent / head matmuls (f32 accumulation)
    # -> compare with a relaxed tolerance.
    assert jnp.allclose(out, ref, atol=2e-2, rtol=2e-2), (out, ref)

    print("KERNEL_OK")
</pallas_src>

<mosaic_0001>
module attributes {stable_mosaic.version = 11 : i64} {
  func.func @gru_kernel(%arg0: i32, %arg1: memref<64x128xf32, #tpu.memory_space<vmem>>, %arg2: memref<128x384xf32, #tpu.memory_space<vmem>>, %arg3: memref<1x384xf32, #tpu.memory_space<vmem>>, %arg4: memref<128x384xbf16, #tpu.memory_space<vmem>>, %arg5: memref<1x384xf32, #tpu.memory_space<vmem>>, %arg6: memref<128x128xbf16, #tpu.memory_space<vmem>>, %arg7: memref<1x128xf32, #tpu.memory_space<vmem>>, %arg8: memref<8x128xf32, #tpu.memory_space<vmem>>, %arg9: memref<64x384xf32, #tpu.memory_space<vmem>>) attributes {dimension_semantics = [#tpu.dimension_semantics<arbitrary>], iteration_bounds = array<i64: 1>, scalar_prefetch = 0 : i64, scratch_operands = 1 : i64, tpu.core_type = #tpu.core_type<tc>, window_params = [{pipeline_mode = #tpu.pipeline_mode<synchronous>, transform_indices = @transform_0, window_bounds = array<i64: 64, 128>}, {pipeline_mode = #tpu.pipeline_mode<synchronous>, transform_indices = @transform_1, window_bounds = array<i64: 128, 384>}, {pipeline_mode = #tpu.pipeline_mode<synchronous>, transform_indices = @transform_2, window_bounds = array<i64: 1, 384>}, {pipeline_mode = #tpu.pipeline_mode<synchronous>, transform_indices = @transform_3, window_bounds = array<i64: 128, 384>}, {pipeline_mode = #tpu.pipeline_mode<synchronous>, transform_indices = @transform_4, window_bounds = array<i64: 1, 384>}, {pipeline_mode = #tpu.pipeline_mode<synchronous>, transform_indices = @transform_5, window_bounds = array<i64: 128, 128>}, {pipeline_mode = #tpu.pipeline_mode<synchronous>, transform_indices = @transform_6, window_bounds = array<i64: 1, 128>}, {pipeline_mode = #tpu.pipeline_mode<synchronous>, transform_indices = @transform_7, window_bounds = array<i64: 8, 128>}]} {
    %c0 = arith.constant 0 : index
    %c0_0 = arith.constant 0 : index
    %0 = vector.load %arg1[%c0, %c0_0] : memref<64x128xf32, #tpu.memory_space<vmem>>, vector<64x128xf32>
    %c0_1 = arith.constant 0 : index
    %c0_2 = arith.constant 0 : index
    %1 = vector.load %arg2[%c0_1, %c0_2] : memref<128x384xf32, #tpu.memory_space<vmem>>, vector<128x384xf32>
    %cst = arith.constant dense<0.000000e+00> : vector<64x384xf32>
    %2 = tpu.matmul %0, %1, %cst {dimension_numbers = #tpu.dot_dimension_numbers<[1], [0], [0], [1], [0, 0, 1, 1], [], []>} : vector<64x128xf32>, vector<128x384xf32>, vector<64x384xf32> -> vector<64x384xf32>
    %c0_3 = arith.constant 0 : index
    %c0_4 = arith.constant 0 : index
    %3 = vector.load %arg3[%c0_3, %c0_4] : memref<1x384xf32, #tpu.memory_space<vmem>>, vector<1x384xf32>
    %4 = vector.broadcast %3 : vector<1x384xf32> to vector<64x384xf32>
    %5 = arith.addf %2, %4 : vector<64x384xf32>
    %c0_5 = arith.constant 0 : index
    %c0_6 = arith.constant 0 : index
    %6 = vector.load %arg9[%c0_5, %c0_6] : memref<64x384xf32, #tpu.memory_space<vmem>>, vector<64x384xf32>
    tpu.vector_store %arg9[%c0_5, %c0_6], %5 {strides = array<i32>} : memref<64x384xf32, #tpu.memory_space<vmem>>, vector<64x384xf32>,
    %c0_7 = arith.constant 0 : index
    %c0_8 = arith.constant 0 : index
    %7 = vector.load %arg4[%c0_7, %c0_8] : memref<128x384xbf16, #tpu.memory_space<vmem>>, vector<128x384xbf16>
    %c0_9 = arith.constant 0 : index
    %c0_10 = arith.constant 0 : index
    %8 = vector.load %arg5[%c0_9, %c0_10] : memref<1x384xf32, #tpu.memory_space<vmem>>, vector<1x384xf32>
    %cst_11 = arith.constant 0.000000e+00 : f32
    %9 = vector.broadcast %cst_11 : f32 to vector<8x128xf32>
    %c0_i32 = arith.constant 0 : i32
    %c8_i32 = arith.constant 8 : i32
    %10 = arith.muli %c0_i32, %c8_i32 : i32
    %11 = arith.index_cast %10 : i32 to index
    %c0_12 = arith.constant 0 : index
    %12 = vector.load %arg9[%11, %c0_12] : memref<64x384xf32, #tpu.memory_space<vmem>>, vector<8x384xf32>
    %13 = arith.truncf %9 : vector<8x128xf32> to vector<8x128xbf16>
    %cst_13 = arith.constant dense<0.000000e+00> : vector<8x384xf32>
    %14 = tpu.matmul %13, %7, %cst_13 {dimension_numbers = #tpu.dot_dimension_numbers<[1], [0], [0], [1], [0, 0, 1, 1], [], []>} : vector<8x128xbf16>, vector<128x384xbf16>, vector<8x384xf32> -> vector<8x384xf32>
    %15 = vector.broadcast %8 : vector<1x384xf32> to vector<8x384xf32>
    %16 = arith.addf %14, %15 : vector<8x384xf32>
    %17 = vector.extract_strided_slice %12 {offsets = [0, 0], sizes = [8, 128], strides = [1, 1]} : vector<8x384xf32> to vector<8x128xf32>
    %18 = vector.extract_strided_slice %16 {offsets = [0, 0], sizes = [8, 128], strides = [1, 1]} : vector<8x384xf32> to vector<8x128xf32>
    %19 = arith.addf %17, %18 : vector<8x128xf32>
    %20 = arith.negf %19 : vector<8x128xf32>
    %21 = math.exp %20 : vector<8x128xf32>
    %cst_14 = arith.constant 1.000000e+00 : f32
    %22 = vector.broadcast %cst_14 : f32 to vector<8x128xf32>
    %23 = arith.addf %22, %21 : vector<8x128xf32>
    %24 = arith.divf %22, %23 : vector<8x128xf32>
    %25 = vector.extract_strided_slice %12 {offsets = [0, 128], sizes = [8, 128], strides = [1, 1]} : vector<8x384xf32> to vector<8x128xf32>
    %26 = vector.extract_strided_slice %16 {offsets = [0, 128], sizes = [8, 128], strides = [1, 1]} : vector<8x384xf32> to vector<8x128xf32>
    %27 = arith.addf %25, %26 : vector<8x128xf32>
    %28 = arith.negf %27 : vector<8x128xf32>
    %29 = math.exp %28 : vector<8x128xf32>
    %cst_15 = arith.constant 1.000000e+00 : f32
    %30 = vector.broadcast %cst_15 : f32 to vector<8x128xf32>
    %31 = arith.addf %30, %29 : vector<8x128xf32>
    %32 = arith.divf %30, %31 : vector<8x128xf32>
    %33 = vector.extract_strided_slice %12 {offsets = [0, 256], sizes = [8, 128], strides = [1, 1]} : vector<8x384xf32> to vector<8x128xf32>
    %34 = vector.extract_strided_slice %16 {offsets = [0, 256], sizes = [8, 128], strides = [1, 1]} : vector<8x384xf32> to vector<8x128xf32>
    %35 = arith.mulf %24, %34 : vector<8x128xf32>
    %36 = arith.addf %33, %35 : vector<8x128xf32>
    %37 = math.tanh %36 : vector<8x128xf32>
    %cst_16 = arith.constant 1.000000e+00 : f32
    %38 = vector.broadcast %cst_16 : f32 to vector<8x128xf32>
    %39 = arith.subf %38, %32 : vector<8x128xf32>
    %40 = arith.mulf %39, %37 : vector<8x128xf32>
    %41 = arith.mulf %32, %9 : vector<8x128xf32>
    %42 = arith.addf %40, %41 : vector<8x128xf32>
    %c1_i32 = arith.constant 1 : i32
    %c8_i32_17 = arith.constant 8 : i32
    %43 = arith.muli %c1_i32, %c8_i32_17 : i32
    %44 = arith.index_cast %43 : i32 to index
    %c0_18 = arith.constant 0 : index
    %45 = vector.load %arg9[%44, %c0_18] : memref<64x384xf32, #tpu.memory_space<vmem>>, vector<8x384xf32>
    %46 = arith.truncf %42 : vector<8x128xf32> to vector<8x128xbf16>
    %cst_19 = arith.constant dense<0.000000e+00> : vector<8x384xf32>
    %47 = tpu.matmul %46, %7, %cst_19 {dimension_numbers = #tpu.dot_dimension_numbers<[1], [0], [0], [1], [0, 0, 1, 1], [], []>} : vector<8x128xbf16>, vector<128x384xbf16>, vector<8x384xf32> -> vector<8x384xf32>
    %48 = vector.broadcast %8 : vector<1x384xf32> to vector<8x384xf32>
    %49 = arith.addf %47, %48 : vector<8x384xf32>
    %50 = vector.extract_strided_slice %45 {offsets = [0, 0], sizes = [8, 128], strides = [1, 1]} : vector<8x384xf32> to vector<8x128xf32>
    %51 = vector.extract_strided_slice %49 {offsets = [0, 0], sizes = [8, 128], strides = [1, 1]} : vector<8x384xf32> to vector<8x128xf32>
    %52 = arith.addf %50, %51 : vector<8x128xf32>
    %53 = arith.negf %52 : vector<8x128xf32>
    %54 = math.exp %53 : vector<8x128xf32>
    %cst_20 = arith.constant 1.000000e+00 : f32
    %55 = vector.broadcast %cst_20 : f32 to vector<8x128xf32>
    %56 = arith.addf %55, %54 : vector<8x128xf32>
    %57 = arith.divf %55, %56 : vector<8x128xf32>
    %58 = vector.extract_strided_slice %45 {offsets = [0, 128], sizes = [8, 128], strides = [1, 1]} : vector<8x384xf32> to vector<8x128xf32>
    %59 = vector.extract_strided_slice %49 {offsets = [0, 128], sizes = [8, 128], strides = [1, 1]} : vector<8x384xf32> to vector<8x128xf32>
    %60 = arith.addf %58, %59 : vector<8x128xf32>
    %61 = arith.negf %60 : vector<8x128xf32>
    %62 = math.exp %61 : vector<8x128xf32>
    %cst_21 = arith.constant 1.000000e+00 : f32
    %63 = vector.broadcast %cst_21 : f32 to vector<8x128xf32>
    %64 = arith.addf %63, %62 : vector<8x128xf32>
    %65 = arith.divf %63, %64 : vector<8x128xf32>
    %66 = vector.extract_strided_slice %45 {offsets = [0, 256], sizes = [8, 128], strides = [1, 1]} : vector<8x384xf32> to vector<8x128xf32>
    %67 = vector.extract_strided_slice %49 {offsets = [0, 256], sizes = [8, 128], strides = [1, 1]} : vector<8x384xf32> to vector<8x128xf32>
    %68 = arith.mulf %57, %67 : vector<8x128xf32>
    %69 = arith.addf %66, %68 : vector<8x128xf32>
    %70 = math.tanh %69 : vector<8x128xf32>
    %cst_22 = arith.constant 1.000000e+00 : f32
    %71 = vector.broadcast %cst_22 : f32 to vector<8x128xf32>
    %72 = arith.subf %71, %65 : vector<8x128xf32>
    %73 = arith.mulf %72, %70 : vector<8x128xf32>
    %74 = arith.mulf %65, %42 : vector<8x128xf32>
    %75 = arith.addf %73, %74 : vector<8x128xf32>
    %c2_i32 = arith.constant 2 : i32
    %c8_i32_23 = arith.constant 8 : i32
    %76 = arith.muli %c2_i32, %c8_i32_23 : i32
    %77 = arith.index_cast %76 : i32 to index
    %c0_24 = arith.constant 0 : index
    %78 = vector.load %arg9[%77, %c0_24] : memref<64x384xf32, #tpu.memory_space<vmem>>, vector<8x384xf32>
    %79 = arith.truncf %75 : vector<8x128xf32> to vector<8x128xbf16>
    %cst_25 = arith.constant dense<0.000000e+00> : vector<8x384xf32>
    %80 = tpu.matmul %79, %7, %cst_25 {dimension_numbers = #tpu.dot_dimension_numbers<[1], [0], [0], [1], [0, 0, 1, 1], [], []>} : vector<8x128xbf16>, vector<128x384xbf16>, vector<8x384xf32> -> vector<8x384xf32>
    %81 = vector.broadcast %8 : vector<1x384xf32> to vector<8x384xf32>
    %82 = arith.addf %80, %81 : vector<8x384xf32>
    %83 = vector.extract_strided_slice %78 {offsets = [0, 0], sizes = [8, 128], strides = [1, 1]} : vector<8x384xf32> to vector<8x128xf32>
    %84 = vector.extract_strided_slice %82 {offsets = [0, 0], sizes = [8, 128], strides = [1, 1]} : vector<8x384xf32> to vector<8x128xf32>
    %85 = arith.addf %83, %84 : vector<8x128xf32>
    %86 = arith.negf %85 : vector<8x128xf32>
    %87 = math.exp %86 : vector<8x128xf32>
    %cst_26 = arith.constant 1.000000e+00 : f32
    %88 = vector.broadcast %cst_26 : f32 to vector<8x128xf32>
    %89 = arith.addf %88, %87 : vector<8x128xf32>
    %90 = arith.divf %88, %89 : vector<8x128xf32>
    %91 = vector.extract_strided_slice %78 {offsets = [0, 128], sizes = [8, 128], strides = [1, 1]} : vector<8x384xf32> to vector<8x128xf32>
    %92 = vector.extract_strided_slice %82 {offsets = [0, 128], sizes = [8, 128], strides = [1, 1]} : vector<8x384xf32> to vector<8x128xf32>
    %93 = arith.addf %91, %92 : vector<8x128xf32>
    %94 = arith.negf %93 : vector<8x128xf32>
    %95 = math.exp %94 : vector<8x128xf32>
    %cst_27 = arith.constant 1.000000e+00 : f32
    %96 = vector.broadcast %cst_27 : f32 to vector<8x128xf32>
    %97 = arith.addf %96, %95 : vector<8x128xf32>
    %98 = arith.divf %96, %97 : vector<8x128xf32>
    %99 = vector.extract_strided_slice %78 {offsets = [0, 256], sizes = [8, 128], strides = [1, 1]} : vector<8x384xf32> to vector<8x128xf32>
    %100 = vector.extract_strided_slice %82 {offsets = [0, 256], sizes = [8, 128], strides = [1, 1]} : vector<8x384xf32> to vector<8x128xf32>
    %101 = arith.mulf %90, %100 : vector<8x128xf32>
    %102 = arith.addf %99, %101 : vector<8x128xf32>
    %103 = math.tanh %102 : vector<8x128xf32>
    %cst_28 = arith.constant 1.000000e+00 : f32
    %104 = vector.broadcast %cst_28 : f32 to vector<8x128xf32>
    %105 = arith.subf %104, %98 : vector<8x128xf32>
    %106 = arith.mulf %105, %103 : vector<8x128xf32>
    %107 = arith.mulf %98, %75 : vector<8x128xf32>
    %108 = arith.addf %106, %107 : vector<8x128xf32>
    %c3_i32 = arith.constant 3 : i32
    %c8_i32_29 = arith.constant 8 : i32
    %109 = arith.muli %c3_i32, %c8_i32_29 : i32
    %110 = arith.index_cast %109 : i32 to index
    %c0_30 = arith.constant 0 : index
    %111 = vector.load %arg9[%110, %c0_30] : memref<64x384xf32, #tpu.memory_space<vmem>>, vector<8x384xf32>
    %112 = arith.truncf %108 : vector<8x128xf32> to vector<8x128xbf16>
    %cst_31 = arith.constant dense<0.000000e+00> : vector<8x384xf32>
    %113 = tpu.matmul %112, %7, %cst_31 {dimension_numbers = #tpu.dot_dimension_numbers<[1], [0], [0], [1], [0, 0, 1, 1], [], []>} : vector<8x128xbf16>, vector<128x384xbf16>, vector<8x384xf32> -> vector<8x384xf32>
    %114 = vector.broadcast %8 : vector<1x384xf32> to vector<8x384xf32>
    %115 = arith.addf %113, %114 : vector<8x384xf32>
    %116 = vector.extract_strided_slice %111 {offsets = [0, 0], sizes = [8, 128], strides = [1, 1]} : vector<8x384xf32> to vector<8x128xf32>
    %117 = vector.extract_strided_slice %115 {offsets = [0, 0], sizes = [8, 128], strides = [1, 1]} : vector<8x384xf32> to vector<8x128xf32>
    %118 = arith.addf %116, %117 : vector<8x128xf32>
    %119 = arith.negf %118 : vector<8x128xf32>
    %120 = math.exp %119 : vector<8x128xf32>
    %cst_32 = arith.constant 1.000000e+00 : f32
    %121 = vector.broadcast %cst_32 : f32 to vector<8x128xf32>
    %122 = arith.addf %121, %120 : vector<8x128xf32>
    %123 = arith.divf %121, %122 : vector<8x128xf32>
    %124 = vector.extract_strided_slice %111 {offsets = [0, 128], sizes = [8, 128], strides = [1, 1]} : vector<8x384xf32> to vector<8x128xf32>
    %125 = vector.extract_strided_slice %115 {offsets = [0, 128], sizes = [8, 128], strides = [1, 1]} : vector<8x384xf32> to vector<8x128xf32>
    %126 = arith.addf %124, %125 : vector<8x128xf32>
    %127 = arith.negf %126 : vector<8x128xf32>
    %128 = math.exp %127 : vector<8x128xf32>
    %cst_33 = arith.constant 1.000000e+00 : f32
    %129 = vector.broadcast %cst_33 : f32 to vector<8x128xf32>
    %130 = arith.addf %129, %128 : vector<8x128xf32>
    %131 = arith.divf %129, %130 : vector<8x128xf32>
    %132 = vector.extract_strided_slice %111 {offsets = [0, 256], sizes = [8, 128], strides = [1, 1]} : vector<8x384xf32> to vector<8x128xf32>
    %133 = vector.extract_strided_slice %115 {offsets = [0, 256], sizes = [8, 128], strides = [1, 1]} : vector<8x384xf32> to vector<8x128xf32>
    %134 = arith.mulf %123, %133 : vector<8x128xf32>
    %135 = arith.addf %132, %134 : vector<8x128xf32>
    %136 = math.tanh %135 : vector<8x128xf32>
    %cst_34 = arith.constant 1.000000e+00 : f32
    %137 = vector.broadcast %cst_34 : f32 to vector<8x128xf32>
    %138 = arith.subf %137, %131 : vector<8x128xf32>
    %139 = arith.mulf %138, %136 : vector<8x128xf32>
    %140 = arith.mulf %131, %108 : vector<8x128xf32>
    %141 = arith.addf %139, %140 : vector<8x128xf32>
    %c4_i32 = arith.constant 4 : i32
    %c8_i32_35 = arith.constant 8 : i32
    %142 = arith.muli %c4_i32, %c8_i32_35 : i32
    %143 = arith.index_cast %142 : i32 to index
    %c0_36 = arith.constant 0 : index
    %144 = vector.load %arg9[%143, %c0_36] : memref<64x384xf32, #tpu.memory_space<vmem>>, vector<8x384xf32>
    %145 = arith.truncf %141 : vector<8x128xf32> to vector<8x128xbf16>
    %cst_37 = arith.constant dense<0.000000e+00> : vector<8x384xf32>
    %146 = tpu.matmul %145, %7, %cst_37 {dimension_numbers = #tpu.dot_dimension_numbers<[1], [0], [0], [1], [0, 0, 1, 1], [], []>} : vector<8x128xbf16>, vector<128x384xbf16>, vector<8x384xf32> -> vector<8x384xf32>
    %147 = vector.broadcast %8 : vector<1x384xf32> to vector<8x384xf32>
    %148 = arith.addf %146, %147 : vector<8x384xf32>
    %149 = vector.extract_strided_slice %144 {offsets = [0, 0], sizes = [8, 128], strides = [1, 1]} : vector<8x384xf32> to vector<8x128xf32>
    %150 = vector.extract_strided_slice %148 {offsets = [0, 0], sizes = [8, 128], strides = [1, 1]} : vector<8x384xf32> to vector<8x128xf32>
    %151 = arith.addf %149, %150 : vector<8x128xf32>
    %152 = arith.negf %151 : vector<8x128xf32>
    %153 = math.exp %152 : vector<8x128xf32>
    %cst_38 = arith.constant 1.000000e+00 : f32
    %154 = vector.broadcast %cst_38 : f32 to vector<8x128xf32>
    %155 = arith.addf %154, %153 : vector<8x128xf32>
    %156 = arith.divf %154, %155 : vector<8x128xf32>
    %157 = vector.extract_strided_slice %144 {offsets = [0, 128], sizes = [8, 128], strides = [1, 1]} : vector<8x384xf32> to vector<8x128xf32>
    %158 = vector.extract_strided_slice %148 {offsets = [0, 128], sizes = [8, 128], strides = [1, 1]} : vector<8x384xf32> to vector<8x128xf32>
    %159 = arith.addf %157, %158 : vector<8x128xf32>
    %160 = arith.negf %159 : vector<8x128xf32>
    %161 = math.exp %160 : vector<8x128xf32>
    %cst_39 = arith.constant 1.000000e+00 : f32
    %162 = vector.broadcast %cst_39 : f32 to vector<8x128xf32>
    %163 = arith.addf %162, %161 : vector<8x128xf32>
    %164 = arith.divf %162, %163 : vector<8x128xf32>
    %165 = vector.extract_strided_slice %144 {offsets = [0, 256], sizes = [8, 128], strides = [1, 1]} : vector<8x384xf32> to vector<8x128xf32>
    %166 = vector.extract_strided_slice %148 {offsets = [0, 256], sizes = [8, 128], strides = [1, 1]} : vector<8x384xf32> to vector<8x128xf32>
    %167 = arith.mulf %156, %166 : vector<8x128xf32>
    %168 = arith.addf %165, %167 : vector<8x128xf32>
    %169 = math.tanh %168 : vector<8x128xf32>
    %cst_40 = arith.constant 1.000000e+00 : f32
    %170 = vector.broadcast %cst_40 : f32 to vector<8x128xf32>
    %171 = arith.subf %170, %164 : vector<8x128xf32>
    %172 = arith.mulf %171, %169 : vector<8x128xf32>
    %173 = arith.mulf %164, %141 : vector<8x128xf32>
    %174 = arith.addf %172, %173 : vector<8x128xf32>
    %c5_i32 = arith.constant 5 : i32
    %c8_i32_41 = arith.constant 8 : i32
    %175 = arith.muli %c5_i32, %c8_i32_41 : i32
    %176 = arith.index_cast %175 : i32 to index
    %c0_42 = arith.constant 0 : index
    %177 = vector.load %arg9[%176, %c0_42] : memref<64x384xf32, #tpu.memory_space<vmem>>, vector<8x384xf32>
    %178 = arith.truncf %174 : vector<8x128xf32> to vector<8x128xbf16>
    %cst_43 = arith.constant dense<0.000000e+00> : vector<8x384xf32>
    %179 = tpu.matmul %178, %7, %cst_43 {dimension_numbers = #tpu.dot_dimension_numbers<[1], [0], [0], [1], [0, 0, 1, 1], [], []>} : vector<8x128xbf16>, vector<128x384xbf16>, vector<8x384xf32> -> vector<8x384xf32>
    %180 = vector.broadcast %8 : vector<1x384xf32> to vector<8x384xf32>
    %181 = arith.addf %179, %180 : vector<8x384xf32>
    %182 = vector.extract_strided_slice %177 {offsets = [0, 0], sizes = [8, 128], strides = [1, 1]} : vector<8x384xf32> to vector<8x128xf32>
    %183 = vector.extract_strided_slice %181 {offsets = [0, 0], sizes = [8, 128], strides = [1, 1]} : vector<8x384xf32> to vector<8x128xf32>
    %184 = arith.addf %182, %183 : vector<8x128xf32>
    %185 = arith.negf %184 : vector<8x128xf32>
    %186 = math.exp %185 : vector<8x128xf32>
    %cst_44 = arith.constant 1.000000e+00 : f32
    %187 = vector.broadcast %cst_44 : f32 to vector<8x128xf32>
    %188 = arith.addf %187, %186 : vector<8x128xf32>
    %189 = arith.divf %187, %188 : vector<8x128xf32>
    %190 = vector.extract_strided_slice %177 {offsets = [0, 128], sizes = [8, 128], strides = [1, 1]} : vector<8x384xf32> to vector<8x128xf32>
    %191 = vector.extract_strided_slice %181 {offsets = [0, 128], sizes = [8, 128], strides = [1, 1]} : vector<8x384xf32> to vector<8x128xf32>
    %192 = arith.addf %190, %191 : vector<8x128xf32>
    %193 = arith.negf %192 : vector<8x128xf32>
    %194 = math.exp %193 : vector<8x128xf32>
    %cst_45 = arith.constant 1.000000e+00 : f32
    %195 = vector.broadcast %cst_45 : f32 to vector<8x128xf32>
    %196 = arith.addf %195, %194 : vector<8x128xf32>
    %197 = arith.divf %195, %196 : vector<8x128xf32>
    %198 = vector.extract_strided_slice %177 {offsets = [0, 256], sizes = [8, 128], strides = [1, 1]} : vector<8x384xf32> to vector<8x128xf32>
    %199 = vector.extract_strided_slice %181 {offsets = [0, 256], sizes = [8, 128], strides = [1, 1]} : vector<8x384xf32> to vector<8x128xf32>
    %200 = arith.mulf %189, %199 : vector<8x128xf32>
    %201 = arith.addf %198, %200 : vector<8x128xf32>
    %202 = math.tanh %201 : vector<8x128xf32>
    %cst_46 = arith.constant 1.000000e+00 : f32
    %203 = vector.broadcast %cst_46 : f32 to vector<8x128xf32>
    %204 = arith.subf %203, %197 : vector<8x128xf32>
    %205 = arith.mulf %204, %202 : vector<8x128xf32>
    %206 = arith.mulf %197, %174 : vector<8x128xf32>
    %207 = arith.addf %205, %206 : vector<8x128xf32>
    %c6_i32 = arith.constant 6 : i32
    %c8_i32_47 = arith.constant 8 : i32
    %208 = arith.muli %c6_i32, %c8_i32_47 : i32
    %209 = arith.index_cast %208 : i32 to index
    %c0_48 = arith.constant 0 : index
    %210 = vector.load %arg9[%209, %c0_48] : memref<64x384xf32, #tpu.memory_space<vmem>>, vector<8x384xf32>
    %211 = arith.truncf %207 : vector<8x128xf32> to vector<8x128xbf16>
    %cst_49 = arith.constant dense<0.000000e+00> : vector<8x384xf32>
    %212 = tpu.matmul %211, %7, %cst_49 {dimension_numbers = #tpu.dot_dimension_numbers<[1], [0], [0], [1], [0, 0, 1, 1], [], []>} : vector<8x128xbf16>, vector<128x384xbf16>, vector<8x384xf32> -> vector<8x384xf32>
    %213 = vector.broadcast %8 : vector<1x384xf32> to vector<8x384xf32>
    %214 = arith.addf %212, %213 : vector<8x384xf32>
    %215 = vector.extract_strided_slice %210 {offsets = [0, 0], sizes = [8, 128], strides = [1, 1]} : vector<8x384xf32> to vector<8x128xf32>
    %216 = vector.extract_strided_slice %214 {offsets = [0, 0], sizes = [8, 128], strides = [1, 1]} : vector<8x384xf32> to vector<8x128xf32>
    %217 = arith.addf %215, %216 : vector<8x128xf32>
    %218 = arith.negf %217 : vector<8x128xf32>
    %219 = math.exp %218 : vector<8x128xf32>
    %cst_50 = arith.constant 1.000000e+00 : f32
    %220 = vector.broadcast %cst_50 : f32 to vector<8x128xf32>
    %221 = arith.addf %220, %219 : vector<8x128xf32>
    %222 = arith.divf %220, %221 : vector<8x128xf32>
    %223 = vector.extract_strided_slice %210 {offsets = [0, 128], sizes = [8, 128], strides = [1, 1]} : vector<8x384xf32> to vector<8x128xf32>
    %224 = vector.extract_strided_slice %214 {offsets = [0, 128], sizes = [8, 128], strides = [1, 1]} : vector<8x384xf32> to vector<8x128xf32>
    %225 = arith.addf %223, %224 : vector<8x128xf32>
    %226 = arith.negf %225 : vector<8x128xf32>
    %227 = math.exp %226 : vector<8x128xf32>
    %cst_51 = arith.constant 1.000000e+00 : f32
    %228 = vector.broadcast %cst_51 : f32 to vector<8x128xf32>
    %229 = arith.addf %228, %227 : vector<8x128xf32>
    %230 = arith.divf %228, %229 : vector<8x128xf32>
    %231 = vector.extract_strided_slice %210 {offsets = [0, 256], sizes = [8, 128], strides = [1, 1]} : vector<8x384xf32> to vector<8x128xf32>
    %232 = vector.extract_strided_slice %214 {offsets = [0, 256], sizes = [8, 128], strides = [1, 1]} : vector<8x384xf32> to vector<8x128xf32>
    %233 = arith.mulf %222, %232 : vector<8x128xf32>
    %234 = arith.addf %231, %233 : vector<8x128xf32>
    %235 = math.tanh %234 : vector<8x128xf32>
    %cst_52 = arith.constant 1.000000e+00 : f32
    %236 = vector.broadcast %cst_52 : f32 to vector<8x128xf32>
    %237 = arith.subf %236, %230 : vector<8x128xf32>
    %238 = arith.mulf %237, %235 : vector<8x128xf32>
    %239 = arith.mulf %230, %207 : vector<8x128xf32>
    %240 = arith.addf %238, %239 : vector<8x128xf32>
    %c7_i32 = arith.constant 7 : i32
    %c8_i32_53 = arith.constant 8 : i32
    %241 = arith.muli %c7_i32, %c8_i32_53 : i32
    %242 = arith.index_cast %241 : i32 to index
    %c0_54 = arith.constant 0 : index
    %243 = vector.load %arg9[%242, %c0_54] : memref<64x384xf32, #tpu.memory_space<vmem>>, vector<8x384xf32>
    %244 = arith.truncf %240 : vector<8x128xf32> to vector<8x128xbf16>
    %cst_55 = arith.constant dense<0.000000e+00> : vector<8x384xf32>
    %245 = tpu.matmul %244, %7, %cst_55 {dimension_numbers = #tpu.dot_dimension_numbers<[1], [0], [0], [1], [0, 0, 1, 1], [], []>} : vector<8x128xbf16>, vector<128x384xbf16>, vector<8x384xf32> -> vector<8x384xf32>
    %246 = vector.broadcast %8 : vector<1x384xf32> to vector<8x384xf32>
    %247 = arith.addf %245, %246 : vector<8x384xf32>
    %248 = vector.extract_strided_slice %243 {offsets = [0, 0], sizes = [8, 128], strides = [1, 1]} : vector<8x384xf32> to vector<8x128xf32>
    %249 = vector.extract_strided_slice %247 {offsets = [0, 0], sizes = [8, 128], strides = [1, 1]} : vector<8x384xf32> to vector<8x128xf32>
    %250 = arith.addf %248, %249 : vector<8x128xf32>
    %251 = arith.negf %250 : vector<8x128xf32>
    %252 = math.exp %251 : vector<8x128xf32>
    %cst_56 = arith.constant 1.000000e+00 : f32
    %253 = vector.broadcast %cst_56 : f32 to vector<8x128xf32>
    %254 = arith.addf %253, %252 : vector<8x128xf32>
    %255 = arith.divf %253, %254 : vector<8x128xf32>
    %256 = vector.extract_strided_slice %243 {offsets = [0, 128], sizes = [8, 128], strides = [1, 1]} : vector<8x384xf32> to vector<8x128xf32>
    %257 = vector.extract_strided_slice %247 {offsets = [0, 128], sizes = [8, 128], strides = [1, 1]} : vector<8x384xf32> to vector<8x128xf32>
    %258 = arith.addf %256, %257 : vector<8x128xf32>
    %259 = arith.negf %258 : vector<8x128xf32>
    %260 = math.exp %259 : vector<8x128xf32>
    %cst_57 = arith.constant 1.000000e+00 : f32
    %261 = vector.broadcast %cst_57 : f32 to vector<8x128xf32>
    %262 = arith.addf %261, %260 : vector<8x128xf32>
    %263 = arith.divf %261, %262 : vector<8x128xf32>
    %264 = vector.extract_strided_slice %243 {offsets = [0, 256], sizes = [8, 128], strides = [1, 1]} : vector<8x384xf32> to vector<8x128xf32>
    %265 = vector.extract_strided_slice %247 {offsets = [0, 256], sizes = [8, 128], strides = [1, 1]} : vector<8x384xf32> to vector<8x128xf32>
    %266 = arith.mulf %255, %265 : vector<8x128xf32>
    %267 = arith.addf %264, %266 : vector<8x128xf32>
    %268 = math.tanh %267 : vector<8x128xf32>
    %cst_58 = arith.constant 1.000000e+00 : f32
    %269 = vector.broadcast %cst_58 : f32 to vector<8x128xf32>
    %270 = arith.subf %269, %263 : vector<8x128xf32>
    %271 = arith.mulf %270, %268 : vector<8x128xf32>
    %272 = arith.mulf %263, %240 : vector<8x128xf32>
    %273 = arith.addf %271, %272 : vector<8x128xf32>
    %c8_i32_59 = arith.constant 8 : i32
    %274 = arith.truncf %273 : vector<8x128xf32> to vector<8x128xbf16>
    %c0_60 = arith.constant 0 : index
    %c0_61 = arith.constant 0 : index
    %275 = vector.load %arg6[%c0_60, %c0_61] : memref<128x128xbf16, #tpu.memory_space<vmem>>, vector<128x128xbf16>
    %cst_62 = arith.constant dense<0.000000e+00> : vector<8x128xf32>
    %276 = tpu.matmul %274, %275, %cst_62 {dimension_numbers = #tpu.dot_dimension_numbers<[1], [0], [0], [1], [0, 0, 1, 1], [], []>} : vector<8x128xbf16>, vector<128x128xbf16>, vector<8x128xf32> -> vector<8x128xf32>
    %c0_63 = arith.constant 0 : index
    %c0_64 = arith.constant 0 : index
    %277 = vector.load %arg7[%c0_63, %c0_64] : memref<1x128xf32, #tpu.memory_space<vmem>>, vector<1x128xf32>
    %278 = vector.broadcast %277 : vector<1x128xf32> to vector<8x128xf32>
    %279 = arith.addf %276, %278 : vector<8x128xf32>
    %c0_65 = arith.constant 0 : index
    %c0_66 = arith.constant 0 : index
    %280 = vector.load %arg8[%c0_65, %c0_66] : memref<8x128xf32, #tpu.memory_space<vmem>>, vector<8x128xf32>
    tpu.vector_store %arg8[%c0_65, %c0_66], %279 {strides = array<i32>} : memref<8x128xf32, #tpu.memory_space<vmem>>, vector<8x128xf32>,
    return
  }
  func.func @transform_0(%arg0: i32) -> (i32, i32) {
    %c0_i32 = arith.constant 0 : i32
    %c0_i32_0 = arith.constant 0 : i32
    %c0_i32_1 = arith.constant 0 : i32
    return %c0_i32, %c0_i32_0 : i32, i32
  }
  func.func @transform_1(%arg0: i32) -> (i32, i32) {
    %c0_i32 = arith.constant 0 : i32
    %c0_i32_0 = arith.constant 0 : i32
    %c0_i32_1 = arith.constant 0 : i32
    return %c0_i32, %c0_i32_0 : i32, i32
  }
  func.func @transform_2(%arg0: i32) -> (i32, i32) {
    %c0_i32 = arith.constant 0 : i32
    %c0_i32_0 = arith.constant 0 : i32
    %c0_i32_1 = arith.constant 0 : i32
    return %c0_i32, %c0_i32_0 : i32, i32
  }
  func.func @transform_3(%arg0: i32) -> (i32, i32) {
    %c0_i32 = arith.constant 0 : i32
    %c0_i32_0 = arith.constant 0 : i32
    %c0_i32_1 = arith.constant 0 : i32
    return %c0_i32, %c0_i32_0 : i32, i32
  }
  func.func @transform_4(%arg0: i32) -> (i32, i32) {
    %c0_i32 = arith.constant 0 : i32
    %c0_i32_0 = arith.constant 0 : i32
    %c0_i32_1 = arith.constant 0 : i32
    return %c0_i32, %c0_i32_0 : i32, i32
  }
  func.func @transform_5(%arg0: i32) -> (i32, i32) {
    %c0_i32 = arith.constant 0 : i32
    %c0_i32_0 = arith.constant 0 : i32
    %c0_i32_1 = arith.constant 0 : i32
    return %c0_i32, %c0_i32_0 : i32, i32
  }
  func.func @transform_6(%arg0: i32) -> (i32, i32) {
    %c0_i32 = arith.constant 0 : i32
    %c0_i32_0 = arith.constant 0 : i32
    %c0_i32_1 = arith.constant 0 : i32
    return %c0_i32, %c0_i32_0 : i32, i32
  }
  func.func @transform_7(%arg0: i32) -> (i32, i32) {
    %c0_i32 = arith.constant 0 : i32
    %c0_i32_0 = arith.constant 0 : i32
    %c0_i32_1 = arith.constant 0 : i32
    return %c0_i32, %c0_i32_0 : i32, i32
  }
}

</mosaic_0001>

<bundles_post_ra>
// kernel: gru_model_forward.1
= control target key start
LH: loop header
LB: loop body
LE: loop exit
PB: predicated region body
PF: predicated region fallthrough
CT: control target
= control target key end

     0   :  { %v2887_v3 = vmov 0.0   ;;  %vm2010_vm0 = vmmov 0   ;;  %s2877_s1 = inlined_call_operand.vmem [shape: f32[128,384], index: 1, kind: input, shape index: {}]   ;;  %s2878_s3 = inlined_call_operand.vmem [shape: bf16[128,384], index: 3, kind: input, shape index: {}]   ;;  %s2879_s0 = inlined_call_operand.vmem [shape: f32[64,128], index: 0, kind: input, shape index: {}]   ;;  %s2880_s2 = inlined_call_operand.vmem [shape: f32[1,384], index: 2, kind: input, shape index: {}]   ;;  %s2881_s4 = inlined_call_operand.vmem [shape: f32[1,384], index: 4, kind: input, shape index: {}]   ;;  %s2882_s5 = inlined_call_operand.vmem [shape: bf16[128,128], index: 5, kind: input, shape index: {}]   ;;  %s2883_s6 = inlined_call_operand.vmem [shape: f32[1,128], index: 6, kind: input, shape index: {}]   ;;  %s2884_s7 = inlined_call_operand.vmem [shape: f32[8,128], index: 7, kind: output, shape index: {}]  }
   0x1   :  { %v81_v0 = vld [vmem:[%s2877_s1 + $0x170] sm:$0xff]  ;;  %v80_v1 = vld [vmem:[%s2877_s1 + $0x168] sm:$0xff]  ;;  %v78_v2 = vld [vmem:[%s2877_s1 + $0x158] sm:$0xff]  ;;  %164 = vmatprep.mubr.f32.mxu0 %v2887_v3 }
   0x2   :  { %100 = vmatprep.subr.mxu0 %v81_v0  ;;  %v77_v4 = vld [vmem:[%s2877_s1 + $0x150] sm:$0xff]  ;;  %v75_v5 = vld [vmem:[%s2877_s1 + $0x140] sm:$0xff]  ;;  %v74_v6 = vld [vmem:[%s2877_s1 + $0x138] sm:$0xff] }
   0x3   :  { %101 = vmatpush1.msra.mxu0 %v80_v1  ;;  %v72_v7 = vld [vmem:[%s2877_s1 + $0x128] sm:$0xff]  ;;  %v71_v8 = vld [vmem:[%s2877_s1 + $0x120] sm:$0xff]  ;;  %v69_v9 = vld [vmem:[%s2877_s1 + $0x110] sm:$0xff] }
   0x4   :  { %102 = vmatprep.subr.mxu0 %v78_v2  ;;  %v68_v10 = vld [vmem:[%s2877_s1 + $0x108] sm:$0xff]  ;;  %v66_v11 = vld [vmem:[%s2877_s1 + $0xf8] sm:$0xff]  ;;  %v65_v12 = vld [vmem:[%s2877_s1 + $0xf0] sm:$0xff] }
   0x5   :  { %103 = vmatpush1.msra.mxu0 %v77_v4  ;;  %v63_v13 = vld [vmem:[%s2877_s1 + $0xe0] sm:$0xff]  ;;  %v82_v14 = vld [vmem:[%s2877_s1 + $0x178] sm:$0xff]  ;;  %v60_v17 = vld [vmem:[%s2877_s1 + $0xc8] sm:$0xff] }
   0x6   :  { %104 = vmatprep.subr.mxu0 %v75_v5  ;;  %v62_v15 = vld [vmem:[%s2877_s1 + $0xd8] sm:$0xff]  ;;  %1637 = vmatprep.subr.mxu1 %v82_v14  ;;  %v79_v16 = vld [vmem:[%s2877_s1 + $0x160] sm:$0xff]  ;;  %v76_v18 = vld [vmem:[%s2877_s1 + $0x148] sm:$0xff] }
   0x7   :  { %105 = vmatpush1.msra.mxu0 %v74_v6  ;;  %1638 = vmatpush3.msra.mxu1 %v82_v14  ;;  %v59_v19 = vld [vmem:[%s2877_s1 + $0xc0] sm:$0xff]  ;;  %v57_v20 = vld [vmem:[%s2877_s1 + $0xb0] sm:$0xff]  ;;  %v56_v22 = vld [vmem:[%s2877_s1 + $0xa8] sm:$0xff] }
   0x8   :  { %106 = vmatprep.subr.mxu0 %v72_v7  ;;  %1639 = vmatprep.subr.mxu1 %v79_v16  ;;  %v73_v21 = vld [vmem:[%s2877_s1 + $0x130] sm:$0xff]  ;;  %v54_v23 = vld [vmem:[%s2877_s1 + $0x98] sm:$0xff]  ;;  %v51_v26 = vld [vmem:[%s2877_s1 + $0x80] sm:$0xff] }
   0x9   :  { %107 = vmatpush1.msra.mxu0 %v71_v8  ;;  %1640 = vmatpush3.msra.mxu1 %v79_v16  ;;  %v70_v24 = vld [vmem:[%s2877_s1 + $0x118] sm:$0xff]  ;;  %v53_v25 = vld [vmem:[%s2877_s1 + $0x90] sm:$0xff]  ;;  %v67_v27 = vld [vmem:[%s2877_s1 + $0x100] sm:$0xff] }
   0xa   :  { %108 = vmatprep.subr.mxu0 %v69_v9  ;;  %1641 = vmatprep.subr.mxu1 %v76_v18  ;;  %v50_v28 = vld [vmem:[%s2877_s1 + $0x78] sm:$0xff]  ;;  %v48_v29 = vld [vmem:[%s2877_s1 + $0x68] sm:$0xff]  ;;  %v47_v31 = vld [vmem:[%s2877_s1 + $0x60] sm:$0xff] }
   0xb   :  { %109 = vmatpush1.msra.mxu0 %v68_v10  ;;  %1642 = vmatpush3.msra.mxu1 %v76_v18  ;;  %v64_v30 = vld [vmem:[%s2877_s1 + $0xe8] sm:$0xff]  ;;  %v45_v32 = vld [vmem:[%s2877_s1 + $0x50] sm:$0xff]  ;;  %v42_v35 = vld [vmem:[%s2877_s1 + $0x38] sm:$0xff] }
   0xc   :  { %110 = vmatprep.subr.mxu0 %v66_v11  ;;  %1643 = vmatprep.subr.mxu1 %v73_v21  ;;  %v61_v33 = vld [vmem:[%s2877_s1 + $0xd0] sm:$0xff]  ;;  %v44_v34 = vld [vmem:[%s2877_s1 + $0x48] sm:$0xff]  ;;  %v58_v36 = vld [vmem:[%s2877_s1 + $0xb8] sm:$0xff] }
   0xd   :  { %111 = vmatpush1.msra.mxu0 %v65_v12  ;;  %1644 = vmatpush3.msra.mxu1 %v73_v21  ;;  %v41_v37 = vld [vmem:[%s2877_s1 + $0x30] sm:$0xff]  ;;  %v39_v38 = vld [vmem:[%s2877_s1 + $0x20] sm:$0xff]  ;;  %v38_v40 = vld [vmem:[%s2877_s1 + $0x18] sm:$0xff] }
   0xe   :  { %112 = vmatprep.subr.mxu0 %v63_v13  ;;  %1645 = vmatprep.subr.mxu1 %v70_v24  ;;  %v55_v39 = vld [vmem:[%s2877_s1 + $0xa0] sm:$0xff]  ;;  %v36_v41 = vld [vmem:[%s2877_s1 + $0x8] sm:$0xff]  ;;  %v49_v49 = vld [vmem:[%s2877_s1 + $0x70] sm:$0xff] }
   0xf   :  { %113 = vmatpush1.msra.mxu0 %v62_v15  ;;  %1646 = vmatpush3.msra.mxu1 %v70_v24  ;;  %v35_v42 = vld [vmem:[%s2877_s1] sm:$0xff]  ;;  %v52_v44 = vld [vmem:[%s2877_s1 + $0x88] sm:$0xff]  ;;  %v2209_v50 = vld [vmem:[%s2878_s3 + $0x90] ss:$12 sps:$4 sm:$0xff]   ;;  %v2885_v15 = vmov 0  }
  0x10   :  { %114 = vmatprep.subr.mxu0 %v60_v17  ;;  %1647 = vmatprep.subr.mxu1 %v67_v27  ;;  %v27_v43 = vld [vmem:[%s2879_s0] sm:$0xff]  ;;  %v2187_v45 = vld [vmem:[%s2878_s3 + $0xac] ss:$12 sps:$4 sm:$0xff]   ;;  %v2192_v46 = vld [vmem:[%s2878_s3 + $0xa8] ss:$12 sps:$4 sm:$0xff]  }
  0x11   :  { %115 = vmatpush1.msra.mxu0 %v59_v19  ;;  %1648 = vmatpush3.msra.mxu1 %v67_v27  ;;  %v2197_v47 = vld [vmem:[%s2878_s3 + $0x94] ss:$12 sps:$4 sm:$0xff]   ;;  %v28_v48 = vld [vmem:[%s2879_s0 + $0x8] sm:$0xff]  ;;  %v46_v51 = vld [vmem:[%s2877_s1 + $0x58] sm:$0xff]  ;;  %v85_v19 = vlaneseq }
  0x12   :  { %116 = vmatprep.subr.mxu0 %v57_v20  ;;  %1649 = vmatprep.subr.mxu1 %v64_v30  ;;  %v2220_v52 = vld [vmem:[%s2878_s3 + $0x7c] ss:$12 sps:$4 sm:$0xff]   ;;  %v43_v53 = vld [vmem:[%s2877_s1 + $0x40] sm:$0xff]  ;;  %v29_v54 = vld [vmem:[%s2879_s0 + $0x10] sm:$0xff] }
  0x13   :  { %117 = vmatpush1.msra.mxu0 %v56_v22  ;;  %1650 = vmatpush3.msra.mxu1 %v64_v30  ;;  %v2233_v55 = vld [vmem:[%s2878_s3 + $0x78] ss:$12 sps:$4 sm:$0xff]   ;;  %v40_v57 = vld [vmem:[%s2877_s1 + $0x28] sm:$0xff]  ;;  %v37_v60 = vld [vmem:[%s2877_s1 + $0x10] sm:$0xff]  ;;  %v2421_v20 = vshrl.u32 %v85_v19, 7 }
  0x14   :  { %118 = vmatprep.subr.mxu0 %v54_v23  ;;  %1651 = vmatprep.subr.mxu1 %v61_v33  ;;  %v2239_v56 = vld [vmem:[%s2878_s3 + $0x64] ss:$12 sps:$4 sm:$0xff]   ;;  %v30_v58 = vld [vmem:[%s2879_s0 + $0x18] sm:$0xff]  ;;  %v2252_v59 = vld [vmem:[%s2878_s3 + $0x60] ss:$12 sps:$4 sm:$0xff]  }
  0x15   :  { %119 = vmatpush1.msra.mxu0 %v53_v25  ;;  %1652 = vmatpush3.msra.mxu1 %v61_v33  ;;  %v2261_v61 = vld [vmem:[%s2878_s3 + $0x4c] ss:$12 sps:$4 sm:$0xff]   ;;  %v2266_v62 = vld [vmem:[%s2878_s3 + $0xb0] ss:$12 sps:$4 sm:$0xff]   ;;  %v31_v63 = vld [vmem:[%s2879_s0 + $0x20] sm:$0xff]  ;;  %v87_v21 = vsub.s32 0, %v2421_v20 }
  0x16   :  { %120 = vmatprep.subr.mxu0 %v51_v26  ;;  %1653 = vmatprep.subr.mxu1 %v58_v36  ;;  %v2276_v0 = vld [vmem:[%s2878_s3 + $0x48] ss:$12 sps:$4 sm:$0xff]   ;;  %v2289_v2 = vld [vmem:[%s2878_s3 + $0x98] ss:$12 sps:$4 sm:$0xff]   ;;  %v2299_v5 = vld [vmem:[%s2878_s3 + $0x30] ss:$12 sps:$4 sm:$0xff]  }
  0x17   :  { %121 = vmatpush1.msra.mxu0 %v50_v28  ;;  %1654 = vmatpush3.msra.mxu1 %v58_v36  ;;  %v2282_v1 = vld [vmem:[%s2878_s3 + $0x34] ss:$12 sps:$4 sm:$0xff]   ;;  %v32_v4 = vld [vmem:[%s2879_s0 + $0x28] sm:$0xff]  ;;  %v2322_v9 = vld [vmem:[%s2878_s3 + $0x18] ss:$12 sps:$4 sm:$0xff]   ;;  %v91_v24 = vsub.s32 1, %v2421_v20 }
  0x18   :  { %122 = vmatprep.subr.mxu0 %v48_v29  ;;  %1655 = vmatprep.subr.mxu1 %v55_v39  ;;  %v2305_v6 = vld [vmem:[%s2878_s3 + $0x1c] ss:$12 sps:$4 sm:$0xff]   ;;  %v2312_v7 = vld [vmem:[%s2878_s3 + $0x80] ss:$12 sps:$4 sm:$0xff]   ;;  %v33_v8 = vld [vmem:[%s2879_s0 + $0x30] sm:$0xff]  ;;  %v2889_v33 = vsub.s32 2, %v2421_v20 }
  0x19   :  { %123 = vmatpush1.msra.mxu0 %v47_v31  ;;  %1656 = vmatpush3.msra.mxu1 %v55_v39  ;;  %v2328_v10 = vld [vmem:[%s2878_s3 + $0x4] ss:$12 sps:$4 sm:$0xff]   ;;  %v2335_v11 = vld [vmem:[%s2878_s3 + $0x68] ss:$12 sps:$4 sm:$0xff]   ;;  %v34_v12 = vld [vmem:[%s2879_s0 + $0x38] sm:$0xff] }
  0x1a   :  { %124 = vmatprep.subr.mxu0 %v45_v32  ;;  %1657 = vmatprep.subr.mxu1 %v52_v44  ;;  %v2345_v13 = vld [vmem:[%s2878_s3] ss:$12 sps:$4 sm:$0xff]   ;;  %v2353_v14 = vld [vmem:[%s2878_s3 + $0x50] ss:$12 sps:$4 sm:$0xff]   ;;  %v2364_v16 = vld [vmem:[%s2878_s3 + $0x38] ss:$12 sps:$4 sm:$0xff]  }
  0x1b   :  { %125 = vmatpush1.msra.mxu0 %v44_v34  ;;  %1658 = vmatpush3.msra.mxu1 %v52_v44  ;;  %v2376_v17 = vld [vmem:[%s2878_s3 + $0x20] ss:$12 sps:$4 sm:$0xff]   ;;  %v2385_v18 = vld [vmem:[%s2878_s3 + $0x8] ss:$12 sps:$4 sm:$0xff]  }
  0x1c   :  { %126 = vmatprep.subr.mxu0 %v42_v35  ;;  %1659 = vmatprep.subr.mxu1 %v49_v49  ;;  %v83_v22 = vld [vmem:[%s2880_s2] sm:$0x7] }
  0x1d   :  { %127 = vmatpush1.msra.mxu0 %v41_v37  ;;  %1660 = vmatpush3.msra.mxu1 %v49_v49  ;;  %v88_v26 = vrot.slane %v83_v22, %v87_v21  ;;  %v92_v28 = vrot.slane %v83_v22, %v91_v24 }
  0x1e   :  { %128 = vmatprep.subr.mxu0 %v39_v38  ;;  %1669 = vmatprep.mubr.f32.mxu1 %v27_v43  ;;  %v2439_v38 = vrot.slane %v83_v22, %v2889_v33 }
  0x1f   :  { %129 = vmatpush1.msra.mxu0 %v38_v40  ;;  %1661 = vmatprep.subr.mxu1 %v46_v51 }
  0x20   :  { %130 = vmatprep.subr.mxu0 %v36_v41  ;;  %1662 = vmatpush3.msra.mxu1 %v46_v51 }
  0x21   :  { %131 = vmatpush1.msra.mxu0 %v35_v42  ;;  %1663 = vmatprep.subr.mxu1 %v43_v53 }
  0x22   :  { %165 = vmatmul.mubr.f32.vlgmr.msra.gmra.mxu0 %v27_v43  ;;  %522 = vmatprep.subr.bf16.mxu0 %v2187_v45 }
  0x23   :  { %523 = vmatpush1.bf16.msra.mxu0 %v2192_v46  ;;  %170 = vmatprep.mubr.f32.mxu0 %v2887_v3 }
  0x24   :  { %524 = vmatprep.subr.bf16.mxu0 %v2197_v47  ;;  %1664 = vmatpush3.msra.mxu1 %v43_v53 }
  0x25   :  { %1665 = vmatprep.subr.mxu1 %v40_v57 }
  0x26   :  { %171 = vmatmul.mubr.f32.gmra.mxu0 %v28_v48  ;;  %1666 = vmatpush3.msra.mxu1 %v40_v57 }
  0x27   :  { %525 = vmatpush1.bf16.msra.mxu0 %v2209_v50  ;;  %176 = vmatprep.mubr.f32.mxu0 %v2887_v3 }
  0x28   :  { %526 = vmatprep.subr.bf16.mxu0 %v2220_v52  ;;  %1667 = vmatprep.subr.mxu1 %v37_v60 }
  0x29   :  { %1668 = vmatpush3.msra.mxu1 %v37_v60 }
  0x2a   :  { %177 = vmatmul.mubr.f32.gmra.mxu0 %v29_v54  ;;  %1681 = vmatprep.subr.bf16.mxu1 %v2887_v3 }
  0x2b   :  { %527 = vmatpush1.bf16.msra.mxu0 %v2233_v55  ;;  %182 = vmatprep.mubr.f32.mxu0 %v2887_v3 }
  0x2c   :  { %528 = vmatprep.subr.bf16.mxu0 %v2239_v56  ;;  %1670 = vmatmul.mubr.f32.vlgmr.msra.gmra.mxu1 %v28_v48 }
  0x2d   :  { %1682 = vmatpush3.bf16.msra.mxu1 %v2266_v62  ;;  %1672 = vmatprep.mubr.f32.mxu1 %v29_v54 }
  0x2e   :  { %183 = vmatmul.mubr.f32.gmra.mxu0 %v30_v58  ;;  %1683 = vmatprep.subr.bf16.mxu1 %v2887_v3 }
  0x2f   :  { %529 = vmatpush1.bf16.msra.mxu0 %v2252_v59  ;;  %188 = vmatprep.mubr.f32.mxu0 %v2887_v3 }
  0x30   :  { %530 = vmatprep.subr.bf16.mxu0 %v2261_v61  ;;  %1673 = vmatmul.mubr.f32.gmra.mxu1 %v30_v58 }
  0x31   :  { %1684 = vmatpush3.bf16.msra.mxu1 %v2289_v2  ;;  %1675 = vmatprep.mubr.f32.mxu1 %v31_v63 }
  0x32   :  { %189 = vmatmul.mubr.f32.gmra.mxu0 %v31_v63  ;;  %1685 = vmatprep.subr.bf16.mxu1 %v2887_v3 }
  0x33   :  { %531 = vmatpush1.bf16.msra.mxu0 %v2276_v0  ;;  %194 = vmatprep.mubr.f32.mxu0 %v2887_v3 }
  0x34   :  { %532 = vmatprep.subr.bf16.mxu0 %v2282_v1  ;;  %1676 = vmatmul.mubr.f32.gmra.mxu1 %v32_v4 }
  0x35   :  { %1686 = vmatpush3.bf16.msra.mxu1 %v2312_v7  ;;  %1678 = vmatprep.mubr.f32.mxu1 %v33_v8 }
  0x36   :  { %195 = vmatmul.mubr.f32.gmra.mxu0 %v32_v4  ;;  %1687 = vmatprep.subr.bf16.mxu1 %v2887_v3 }
  0x37   :  { %533 = vmatpush1.bf16.msra.mxu0 %v2299_v5  ;;  %200 = vmatprep.mubr.f32.mxu0 %v2887_v3 }
  0x38   :  { %534 = vmatprep.subr.bf16.mxu0 %v2305_v6  ;;  %1679 = vmatmul.mubr.f32.gmra.mxu1 %v34_v12 }
  0x39   :  { %1688 = vmatpush3.bf16.msra.mxu1 %v2335_v11  ;;  %1697 = vmatprep.mubr.msk.bf16.mxu1 %vm2010_vm0, %v2887_v3 }
  0x3a   :  { %201 = vmatmul.mubr.f32.gmra.mxu0 %v33_v8  ;;  %1689 = vmatprep.subr.bf16.mxu1 %v2887_v3 }
  0x3b   :  { %535 = vmatpush1.bf16.msra.mxu0 %v2322_v9  ;;  %206 = vmatprep.mubr.f32.mxu0 %v2887_v3 }
  0x3c   :  { %536 = vmatprep.subr.bf16.mxu0 %v2328_v10 }
  0x3d   :  { %1690 = vmatpush3.bf16.msra.mxu1 %v2353_v14 }
  0x3e   :  { %207 = vmatmul.mubr.f32.gmra.mxu0 %v34_v12  ;;  %1691 = vmatprep.subr.bf16.mxu1 %v2887_v3 }
  0x3f   :  { %537 = vmatpush1.bf16.msra.mxu0 %v2345_v13  ;;  %554 = vmatprep.mubr.bf16.mxu0 %v2885_v15 }
  0x40   :  { %628 = vmatprep.subr.bf16.mxu0 %v2187_v45 }
  0x41   :  { %1692 = vmatpush3.bf16.msra.mxu1 %v2364_v16 }
  0x42   :  { %555 = vmatmul.mubr.bf16.vlgmr.msra.gmra.mxu0 %v2885_v15  ;;  %1693 = vmatprep.subr.bf16.mxu1 %v2887_v3 }
  0x43   :  { %629 = vmatpush1.bf16.msra.mxu0 %v2192_v46  ;;  %660 = vmatprep.mubr.bf16.mxu0 %v2885_v15 }
  0x44   :  { %630 = vmatprep.subr.bf16.mxu0 %v2197_v47 }
  0x45   :  { %1694 = vmatpush3.bf16.msra.mxu1 %v2376_v17 }
  0x46   :  { %1695 = vmatprep.subr.bf16.mxu1 %v2887_v3 }
  0x47   :  { %631 = vmatpush1.bf16.msra.mxu0 %v2209_v50 }
  0x48   :  { %632 = vmatprep.subr.bf16.mxu0 %v2220_v52 }
  0x49   :  { %1696 = vmatpush3.bf16.msra.mxu1 %v2385_v18 }
  0x4a   :  { %1701 = vmatprep.subr.bf16.mxu1 %v2887_v3 }
  0x4b   :  { %633 = vmatpush1.bf16.msra.mxu0 %v2233_v55 }
  0x4c   :  { %634 = vmatprep.subr.bf16.mxu0 %v2239_v56  ;;  %1698 = vmatmul.mubr.bf16.vlgmr.msra.gmra.mxu1 %v2885_v15 }
  0x4d   :  { %1702 = vmatpush3.bf16.msra.mxu1 %v2266_v62  ;;  %1717 = vmatprep.mubr.msk.bf16.mxu1 %vm2010_vm0, %v2887_v3 }
  0x4e   :  { %1703 = vmatprep.subr.bf16.mxu1 %v2887_v3 }
  0x4f   :  { %635 = vmatpush1.bf16.msra.mxu0 %v2252_v59 }
  0x50   :  { %636 = vmatprep.subr.bf16.mxu0 %v2261_v61 }
  0x51   :  { %1704 = vmatpush3.bf16.msra.mxu1 %v2289_v2 }
  0x52   :  { %1705 = vmatprep.subr.bf16.mxu1 %v2887_v3 }
  0x53   :  { %637 = vmatpush1.bf16.msra.mxu0 %v2276_v0 }
  0x54   :  { %638 = vmatprep.subr.bf16.mxu0 %v2282_v1 }
  0x55   :  { %1706 = vmatpush3.bf16.msra.mxu1 %v2312_v7 }
  0x56   :  { %1707 = vmatprep.subr.bf16.mxu1 %v2887_v3 }
  0x57   :  { %639 = vmatpush1.bf16.msra.mxu0 %v2299_v5 }
  0x58   :  { %640 = vmatprep.subr.bf16.mxu0 %v2305_v6 }
  0x59   :  { %1708 = vmatpush3.bf16.msra.mxu1 %v2335_v11 }
  0x5a   :  { %1709 = vmatprep.subr.bf16.mxu1 %v2887_v3 }
  0x5b   :  { %641 = vmatpush1.bf16.msra.mxu0 %v2322_v9 }
  0x5c   :  { %642 = vmatprep.subr.bf16.mxu0 %v2328_v10 }
  0x5d   :  { %1710 = vmatpush3.bf16.msra.mxu1 %v2353_v14 }
  0x5e   :  { %1711 = vmatprep.subr.bf16.mxu1 %v2887_v3 }
  0x5f   :  { %643 = vmatpush1.bf16.msra.mxu0 %v2345_v13 }
  0x60   :  { %734 = vmatprep.subr.bf16.mxu0 %v2187_v45 }
  0x61   :  { %1712 = vmatpush3.bf16.msra.mxu1 %v2364_v16 }
  0x62   :  { %1713 = vmatprep.subr.bf16.mxu1 %v2887_v3 }
  0x65   :  { %1714 = vmatpush3.bf16.msra.mxu1 %v2376_v17 }
  0x66   :  { %1715 = vmatprep.subr.bf16.mxu1 %v2887_v3 }
  0x69   :  { %1716 = vmatpush3.bf16.msra.mxu1 %v2385_v18 }
  0x6a   :  { %1721 = vmatprep.subr.bf16.mxu1 %v2887_v3 }
  0xe2   :  { %v166_v23 = vpop.f32.mrf.mxu0 }
  0xe4   :  { %v168_v25 = vpop.f32.mrf.mxu0 }
  0xe6   :  { %v172_v27 = vpop.f32.mrf.mxu0 }
  0xe7   :  { %v2428_v29 = vadd.f32 %v172_v27, %v88_v26  ;;  %v374_v27 = vld [vmem:[%s2881_s4] sm:$0x7] }
  0xe8   :  { %v174_v30 = vpop.f32.mrf.mxu0  ;;  %v2479_v15 = vrot.slane %v374_v27, %v91_v24  ;;  %v169_v24 = vadd.f32 %v168_v25, %v92_v28 }
  0xe9   :  { %v2430_v31 = vadd.f32 %v174_v30, %v92_v28 }
  0xea   :  { %v178_v32 = vpop.f32.mrf.mxu0 }
  0xeb   :  { %v2433_v34 = vadd.f32 %v178_v32, %v88_v26 }
  0xec   :  { %v180_v35 = vpop.f32.mrf.mxu0  ;;  %v1671_v42 = vpop.f32.mrf.mxu1 }
  0xed   :  { %v2435_v36 = vadd.f32 %v180_v35, %v92_v28  ;;  %v2446_v44 = vadd.f32 %v1671_v42, %v2439_v38 }
  0xee   :  { %v184_v37 = vpop.f32.mrf.mxu0  ;;  %v279_v57 = vpop.f32.mrf.mxu1 }
  0xef   :  { %v2441_v39 = vadd.f32 %v184_v37, %v88_v26 }
  0xf0   :  { %v186_v40 = vpop.f32.mrf.mxu0  ;;  %v1674_v63 = vpop.f32.mrf.mxu1 }
  0xf1   :  { %v2443_v41 = vadd.f32 %v186_v40, %v92_v28  ;;  %v2457_v8 = vadd.f32 %v1674_v63, %v2439_v38  ;;  %v2471_v40 = vrot.slane %v374_v27, %v87_v21 }
  0xf2   :  { %v190_v43 = vpop.f32.mrf.mxu0  ;;  %v289_v19 = vpop.f32.mrf.mxu1 }
  0xf3   :  { %v2448_v48 = vadd.f32 %v190_v43, %v88_v26  ;;  %v2465_v30 = vadd.f32 %v289_v19, %v2439_v38 }
  0xf4   :  { %v192_v49 = vpop.f32.mrf.mxu0  ;;  %v1677_v43 = vpop.f32.mrf.mxu1 }
  0xf5   :  { %v2450_v51 = vadd.f32 %v192_v49, %v92_v28 }
  0xf6   :  { %v196_v53 = vpop.f32.mrf.mxu0  ;;  %v299_v63 = vpop.f32.mrf.mxu1 }
  0xf7   :  { %v2452_v54 = vadd.f32 %v196_v53, %v88_v26  ;;  %v2476_v53 = vadd.f32 %v1677_v43, %v2439_v38 }
  0xf8   :  { %v198_v58 = vpop.f32.mrf.mxu0  ;;  %v1680_v21 = vpop.f32.mrf.mxu1 }
  0xf9   :  { %v2454_v60 = vadd.f32 %v198_v58, %v92_v28  ;;  %v2485_v33 = vadd.f32 %v1680_v21, %v2439_v38 }
  0xfa   :  { %v202_v4 = vpop.f32.mrf.mxu0 }
  0xfb   :  { %v2459_v12 = vadd.f32 %v202_v4, %v88_v26  ;;  %v167_v4 = vadd.f32 %v166_v23, %v88_v26  ;;  %2894 = vst [vmem:[#allocation7_spill] sm:$0xff] %v2485_v33 }
  0xfc   :  { %v204_v22 = vpop.f32.mrf.mxu0 }
  0xfd   :  { %2890 = vst [vmem:[#allocation3_spill] sm:$0xff] %v2459_v12  ;;  %v2467_v32 = vadd.f32 %v204_v22, %v92_v28  ;;  %v2482_v22 = vadd.f32 %v299_v63, %v2439_v38 }
  0xfe   :  { %v208_v35 = vpop.f32.mrf.mxu0 }
  0xff   :  { %2891 = vst [vmem:[#allocation4_spill] sm:$0xff] %v2467_v32  ;;  %v2469_v37 = vadd.f32 %v208_v35, %v88_v26 }
 0x100   :  { %v210_v42 = vpop.f32.mrf.mxu0 }
 0x101   :  { %2892 = vst [vmem:[#allocation5_spill] sm:$0xff] %v2469_v37  ;;  %v2473_v49 = vadd.f32 %v210_v42, %v92_v28  ;;  %v280_v28 = vadd.f32 %v279_v57, %v2439_v38  ;;  %v2897_v57 = vmov 0  }
 0x102   :  { %v556_v58 = vpop.f32.mrf.mxu0 }
 0x103   :  { %2893 = vst [vmem:[#allocation6_spill] sm:$0xff] %v2473_v49  ;;  %v557_v19 = vadd.f32 %v556_v58, %v2471_v40  ;;  %v309_v49 = vpop.f32.mrf.mxu1 }
 0x104   :  { %v558_v35 = vpop.f32.mrf.mxu0  ;;  %v2489_v23 = vadd.f32 %v309_v49, %v2439_v38  ;;  %v2896_v38 = vmov 0.0  }
 0x105   :  { %v603_v3 = vadd.f32 %v557_v19, %v167_v4  ;;  %v559_v37 = vadd.f32 %v558_v35, %v2479_v15 }
 0x106   :  { %v560_v42 = vpop.f32.mrf.mxu0 }
 0x107   :  { %v1507_v43 = vmul.f32 -1.442695, %v603_v3  ;;  %v610_v58 = vadd.f32 %v559_v37, %v169_v24  ;;  %v2895_v3 = vsub.s32 2, %v2421_v20 }
 0x108   :  { %v561_v26 = vpop.f32.mrf.mxu0 }
 0x109   :  { %1904 = vpow2.f32 %v1507_v43  ;;  %v1508_v63 = vmul.f32 -1.442695, %v610_v58  ;;  %v2493_v42 = vrot.slane %v374_v27, %v2895_v3 }
 0x10b   :  { %1906 = vpow2.f32 %v1508_v63 }
 0x10c   :  { %v597_v32 = vpop.f32.mrf.mxu1 }
 0x10d   :  { %v598_v26 = vadd.f32 %v597_v32, %v2493_v42 }
 0x10e   :  { %v1699_v12 = vpop.f32.mrf.mxu1 }
 0x110   :  { %v600_v4 = vpop.f32.mrf.mxu1 }
 0x112   :  { %v1700_v33 = vpop.f32.mrf.mxu1 }
 0x116   :  { %v1905_v19 = vpop.eup %1904 }
 0x117   :  { %v607_v21 = vadd.f32 1.0, %v1905_v19 }
 0x118   :  { %v1907_v35 = vpop.eup %1906 }
 0x119   :  { %1908 = vrcp.f32 %v607_v21  ;;  %v614_v49 = vadd.f32 1.0, %v1907_v35 }
 0x11b   :  { %1910 = vrcp.f32 %v614_v49 }
 0x126   :  { %v1909_v25 = vpop.eup %1908 }
 0x127   :  { %v617_v37 = vmul.f32 %v1909_v25, %v598_v26 }
 0x128   :  { %v1911_v12 = vpop.eup %1910 }
 0x129   :  { %v618_v43 = vadd.f32 %v617_v37, %v280_v28  ;;  %v620_v24 = vsub.f32 1.0, %v1911_v12  ;;  %v622_v63 = vmul.f32 0.0, %v1911_v12 }
 0x12b   :  { %1912 = vtanh.f32 %v618_v43 }
 0x138   :  { %v1913_v58 = vpop.eup %1912 }
 0x139   :  { %v621_v33 = vmul.f32 %v1913_v58, %v620_v24 }
 0x13b   :  { %v2497_v4 = vadd.f32 %v622_v63, %v621_v33 }
 0x13d   :  { %v627_v20 = vpack.c.bf16 %v2497_v4, %v2497_v4 }
 0x13f   :  { %661 = vmatmul.mubr.bf16.vlgmr.msra.gmra.mxu0 %v627_v20  ;;  %1718 = vmatmul.mubr.bf16.vlgmr.msra.gmra.mxu1 %v627_v20 }
 0x140   :  { %735 = vmatpush1.bf16.msra.mxu0 %v2192_v46  ;;  %1722 = vmatpush3.bf16.msra.mxu1 %v2266_v62 }
 0x141   :  { %736 = vmatprep.subr.bf16.mxu0 %v2197_v47  ;;  %1723 = vmatprep.subr.bf16.mxu1 %v2896_v38 }
 0x142   :  { %766 = vmatprep.mubr.bf16.mxu0 %v2897_v57  ;;  %1737 = vmatprep.mubr.msk.bf16.mxu1 %vm2010_vm0, %v2896_v38 }
 0x144   :  { %737 = vmatpush1.bf16.msra.mxu0 %v2209_v50  ;;  %1724 = vmatpush3.bf16.msra.mxu1 %v2289_v2 }
 0x145   :  { %738 = vmatprep.subr.bf16.mxu0 %v2220_v52  ;;  %1725 = vmatprep.subr.bf16.mxu1 %v2896_v38 }
 0x148   :  { %739 = vmatpush1.bf16.msra.mxu0 %v2233_v55  ;;  %1726 = vmatpush3.bf16.msra.mxu1 %v2312_v7 }
 0x149   :  { %740 = vmatprep.subr.bf16.mxu0 %v2239_v56  ;;  %1727 = vmatprep.subr.bf16.mxu1 %v2896_v38 }
 0x14c   :  { %741 = vmatpush1.bf16.msra.mxu0 %v2252_v59  ;;  %1728 = vmatpush3.bf16.msra.mxu1 %v2335_v11 }
 0x14d   :  { %742 = vmatprep.subr.bf16.mxu0 %v2261_v61  ;;  %1729 = vmatprep.subr.bf16.mxu1 %v2896_v38 }
 0x150   :  { %743 = vmatpush1.bf16.msra.mxu0 %v2276_v0  ;;  %1730 = vmatpush3.bf16.msra.mxu1 %v2353_v14 }
 0x151   :  { %744 = vmatprep.subr.bf16.mxu0 %v2282_v1  ;;  %1731 = vmatprep.subr.bf16.mxu1 %v2896_v38 }
 0x154   :  { %745 = vmatpush1.bf16.msra.mxu0 %v2299_v5  ;;  %1732 = vmatpush3.bf16.msra.mxu1 %v2364_v16 }
 0x155   :  { %746 = vmatprep.subr.bf16.mxu0 %v2305_v6  ;;  %1733 = vmatprep.subr.bf16.mxu1 %v2896_v38 }
 0x158   :  { %747 = vmatpush1.bf16.msra.mxu0 %v2322_v9  ;;  %1734 = vmatpush3.bf16.msra.mxu1 %v2376_v17 }
 0x159   :  { %748 = vmatprep.subr.bf16.mxu0 %v2328_v10  ;;  %1735 = vmatprep.subr.bf16.mxu1 %v2896_v38 }
 0x15c   :  { %749 = vmatpush1.bf16.msra.mxu0 %v2345_v13  ;;  %1736 = vmatpush3.bf16.msra.mxu1 %v2385_v18 }
 0x15d   :  { %840 = vmatprep.subr.bf16.mxu0 %v2187_v45  ;;  %1741 = vmatprep.subr.bf16.mxu1 %v2896_v38 }
 0x1ff   :  { %v662_v27 = vpop.f32.mrf.mxu0  ;;  %v703_v32 = vpop.f32.mrf.mxu1 }
 0x200   :  { %v663_v19 = vadd.f32 %v662_v27, %v2471_v40  ;;  %v704_v27 = vadd.f32 %v703_v32, %v2493_v42 }
 0x201   :  { %v664_v21 = vpop.f32.mrf.mxu0  ;;  %v1719_v3 = vpop.f32.mrf.mxu1 }
 0x202   :  { %v709_v35 = vadd.f32 %v663_v19, %v2428_v29  ;;  %v665_v28 = vadd.f32 %v664_v21, %v2479_v15 }
 0x203   :  { %v666_v49 = vpop.f32.mrf.mxu0  ;;  %v706_v26 = vpop.f32.mrf.mxu1 }
 0x204   :  { %v1509_v25 = vmul.f32 -1.442695, %v709_v35  ;;  %v716_v12 = vadd.f32 %v665_v28, %v2430_v31 }
 0x205   :  { %v667_v37 = vpop.f32.mrf.mxu0  ;;  %v1720_v43 = vpop.f32.mrf.mxu1 }
 0x206   :  { %1914 = vpow2.f32 %v1509_v25  ;;  %v1510_v24 = vmul.f32 -1.442695, %v716_v12 }
 0x208   :  { %1916 = vpow2.f32 %v1510_v24 }
 0x213   :  { %v1915_v58 = vpop.eup %1914 }
 0x214   :  { %v713_v33 = vadd.f32 1.0, %v1915_v58 }
 0x215   :  { %v1917_v63 = vpop.eup %1916 }
 0x216   :  { %1918 = vrcp.f32 %v713_v33  ;;  %v720_v20 = vadd.f32 1.0, %v1917_v63 }
 0x218   :  { %1920 = vrcp.f32 %v720_v20 }
 0x223   :  { %v1919_v29 = vpop.eup %1918 }
 0x224   :  { %v723_v19 = vmul.f32 %v1919_v29, %v704_v27 }
 0x225   :  { %v1921_v21 = vpop.eup %1920 }
 0x226   :  { %v724_v3 = vadd.f32 %v723_v19, %v2446_v44  ;;  %v726_v35 = vsub.f32 1.0, %v1921_v21  ;;  %v728_v31 = vmul.f32 %v1921_v21, %v2497_v4 }
 0x228   :  { %1922 = vtanh.f32 %v724_v3 }
 0x235   :  { %v1923_v49 = vpop.eup %1922 }
 0x236   :  { %v727_v26 = vmul.f32 %v1923_v49, %v726_v35 }
 0x238   :  { %v2543_v25 = vadd.f32 %v728_v31, %v727_v26 }
 0x23a   :  { %v733_v28 = vpack.c.bf16 %v2543_v25, %v2543_v25 }
 0x23c   :  { %767 = vmatmul.mubr.bf16.vlgmr.msra.gmra.mxu0 %v733_v28  ;;  %1738 = vmatmul.mubr.bf16.vlgmr.msra.gmra.mxu1 %v733_v28 }
 0x23d   :  { %841 = vmatpush1.bf16.msra.mxu0 %v2192_v46  ;;  %1742 = vmatpush3.bf16.msra.mxu1 %v2266_v62 }
 0x23e   :  { %842 = vmatprep.subr.bf16.mxu0 %v2197_v47  ;;  %1743 = vmatprep.subr.bf16.mxu1 %v2896_v38 }
 0x23f   :  { %872 = vmatprep.mubr.bf16.mxu0 %v2897_v57  ;;  %1757 = vmatprep.mubr.msk.bf16.mxu1 %vm2010_vm0, %v2896_v38 }
 0x241   :  { %843 = vmatpush1.bf16.msra.mxu0 %v2209_v50  ;;  %1744 = vmatpush3.bf16.msra.mxu1 %v2289_v2 }
 0x242   :  { %844 = vmatprep.subr.bf16.mxu0 %v2220_v52  ;;  %1745 = vmatprep.subr.bf16.mxu1 %v2896_v38 }
 0x245   :  { %845 = vmatpush1.bf16.msra.mxu0 %v2233_v55  ;;  %1746 = vmatpush3.bf16.msra.mxu1 %v2312_v7 }
 0x246   :  { %846 = vmatprep.subr.bf16.mxu0 %v2239_v56  ;;  %1747 = vmatprep.subr.bf16.mxu1 %v2896_v38 }
 0x249   :  { %847 = vmatpush1.bf16.msra.mxu0 %v2252_v59  ;;  %1748 = vmatpush3.bf16.msra.mxu1 %v2335_v11 }
 0x24a   :  { %848 = vmatprep.subr.bf16.mxu0 %v2261_v61  ;;  %1749 = vmatprep.subr.bf16.mxu1 %v2896_v38 }
 0x24d   :  { %849 = vmatpush1.bf16.msra.mxu0 %v2276_v0  ;;  %1750 = vmatpush3.bf16.msra.mxu1 %v2353_v14 }
 0x24e   :  { %850 = vmatprep.subr.bf16.mxu0 %v2282_v1  ;;  %1751 = vmatprep.subr.bf16.mxu1 %v2896_v38 }
 0x251   :  { %851 = vmatpush1.bf16.msra.mxu0 %v2299_v5  ;;  %1752 = vmatpush3.bf16.msra.mxu1 %v2364_v16 }
 0x252   :  { %852 = vmatprep.subr.bf16.mxu0 %v2305_v6  ;;  %1753 = vmatprep.subr.bf16.mxu1 %v2896_v38 }
 0x255   :  { %853 = vmatpush1.bf16.msra.mxu0 %v2322_v9  ;;  %1754 = vmatpush3.bf16.msra.mxu1 %v2376_v17 }
 0x256   :  { %854 = vmatprep.subr.bf16.mxu0 %v2328_v10  ;;  %1755 = vmatprep.subr.bf16.mxu1 %v2896_v38 }
 0x259   :  { %855 = vmatpush1.bf16.msra.mxu0 %v2345_v13  ;;  %1756 = vmatpush3.bf16.msra.mxu1 %v2385_v18 }
 0x25a   :  { %946 = vmatprep.subr.bf16.mxu0 %v2187_v45  ;;  %1761 = vmatprep.subr.bf16.mxu1 %v2896_v38 }
 0x2fc   :  { %v768_v44 = vpop.f32.mrf.mxu0  ;;  %v809_v4 = vpop.f32.mrf.mxu1 }
 0x2fd   :  { %v769_v32 = vadd.f32 %v768_v44, %v2471_v40  ;;  %v810_v26 = vadd.f32 %v809_v4, %v2493_v42 }
 0x2fe   :  { %v770_v37 = vpop.f32.mrf.mxu0  ;;  %v1739_v43 = vpop.f32.mrf.mxu1 }
 0x2ff   :  { %v815_v12 = vadd.f32 %v769_v32, %v2433_v34  ;;  %v771_v63 = vadd.f32 %v770_v37, %v2479_v15 }
 0x300   :  { %v772_v24 = vpop.f32.mrf.mxu0  ;;  %v812_v58 = vpop.f32.mrf.mxu1 }
 0x301   :  { %v1511_v33 = vmul.f32 -1.442695, %v815_v12  ;;  %v822_v29 = vadd.f32 %v771_v63, %v2435_v36 }
 0x302   :  { %v773_v20 = vpop.f32.mrf.mxu0  ;;  %v1740_v27 = vpop.f32.mrf.mxu1 }
 0x303   :  { %1924 = vpow2.f32 %v1511_v33  ;;  %v1512_v19 = vmul.f32 -1.442695, %v822_v29 }
 0x305   :  { %1926 = vpow2.f32 %v1512_v19 }
 0x310   :  { %v1925_v3 = vpop.eup %1924 }
 0x311   :  { %v819_v21 = vadd.f32 1.0, %v1925_v3 }
 0x312   :  { %v1927_v35 = vpop.eup %1926 }
 0x313   :  { %1928 = vrcp.f32 %v819_v21  ;;  %v826_v49 = vadd.f32 1.0, %v1927_v35 }
 0x315   :  { %1930 = vrcp.f32 %v826_v49 }
 0x320   :  { %v1929_v34 = vpop.eup %1928 }
 0x321   :  { %v829_v31 = vmul.f32 %v1929_v34, %v810_v26 }
 0x322   :  { %v1931_v44 = vpop.eup %1930 }
 0x323   :  { %v830_v28 = vadd.f32 %v829_v31, %v2465_v30  ;;  %v832_v32 = vsub.f32 1.0, %v1931_v44  ;;  %v834_v36 = vmul.f32 %v1931_v44, %v2543_v25 }
 0x325   :  { %1932 = vtanh.f32 %v830_v28 }
 0x332   :  { %v1933_v37 = vpop.eup %1932 }
 0x333   :  { %v833_v43 = vmul.f32 %v1933_v37, %v832_v32 }
 0x335   :  { %v2589_v12 = vadd.f32 %v834_v36, %v833_v43 }
 0x337   :  { %v839_v24 = vpack.c.bf16 %v2589_v12, %v2589_v12 }
 0x339   :  { %873 = vmatmul.mubr.bf16.vlgmr.msra.gmra.mxu0 %v839_v24  ;;  %1758 = vmatmul.mubr.bf16.vlgmr.msra.gmra.mxu1 %v839_v24 }
 0x33a   :  { %947 = vmatpush1.bf16.msra.mxu0 %v2192_v46  ;;  %1762 = vmatpush3.bf16.msra.mxu1 %v2266_v62 }
 0x33b   :  { %948 = vmatprep.subr.bf16.mxu0 %v2197_v47  ;;  %1763 = vmatprep.subr.bf16.mxu1 %v2896_v38 }
 0x33c   :  { %978 = vmatprep.mubr.bf16.mxu0 %v2897_v57  ;;  %1777 = vmatprep.mubr.msk.bf16.mxu1 %vm2010_vm0, %v2896_v38 }
 0x33e   :  { %949 = vmatpush1.bf16.msra.mxu0 %v2209_v50  ;;  %1764 = vmatpush3.bf16.msra.mxu1 %v2289_v2 }
 0x33f   :  { %950 = vmatprep.subr.bf16.mxu0 %v2220_v52  ;;  %1765 = vmatprep.subr.bf16.mxu1 %v2896_v38 }
 0x342   :  { %951 = vmatpush1.bf16.msra.mxu0 %v2233_v55  ;;  %1766 = vmatpush3.bf16.msra.mxu1 %v2312_v7 }
 0x343   :  { %952 = vmatprep.subr.bf16.mxu0 %v2239_v56  ;;  %1767 = vmatprep.subr.bf16.mxu1 %v2896_v38 }
 0x346   :  { %953 = vmatpush1.bf16.msra.mxu0 %v2252_v59  ;;  %1768 = vmatpush3.bf16.msra.mxu1 %v2335_v11 }
 0x347   :  { %954 = vmatprep.subr.bf16.mxu0 %v2261_v61  ;;  %1769 = vmatprep.subr.bf16.mxu1 %v2896_v38 }
 0x34a   :  { %955 = vmatpush1.bf16.msra.mxu0 %v2276_v0  ;;  %1770 = vmatpush3.bf16.msra.mxu1 %v2353_v14 }
 0x34b   :  { %956 = vmatprep.subr.bf16.mxu0 %v2282_v1  ;;  %1771 = vmatprep.subr.bf16.mxu1 %v2896_v38 }
 0x34e   :  { %957 = vmatpush1.bf16.msra.mxu0 %v2299_v5  ;;  %1772 = vmatpush3.bf16.msra.mxu1 %v2364_v16 }
 0x34f   :  { %958 = vmatprep.subr.bf16.mxu0 %v2305_v6  ;;  %1773 = vmatprep.subr.bf16.mxu1 %v2896_v38 }
 0x352   :  { %959 = vmatpush1.bf16.msra.mxu0 %v2322_v9  ;;  %1774 = vmatpush3.bf16.msra.mxu1 %v2376_v17 }
 0x353   :  { %960 = vmatprep.subr.bf16.mxu0 %v2328_v10  ;;  %1775 = vmatprep.subr.bf16.mxu1 %v2896_v38 }
 0x356   :  { %961 = vmatpush1.bf16.msra.mxu0 %v2345_v13  ;;  %1776 = vmatpush3.bf16.msra.mxu1 %v2385_v18 }
 0x357   :  { %1052 = vmatprep.subr.bf16.mxu0 %v2187_v45  ;;  %1781 = vmatprep.subr.bf16.mxu1 %v2896_v38 }
 0x3f9   :  { %v874_v30 = vpop.f32.mrf.mxu0  ;;  %v915_v25 = vpop.f32.mrf.mxu1 }
 0x3fa   :  { %v875_v4 = vadd.f32 %v874_v30, %v2471_v40  ;;  %v916_v44 = vadd.f32 %v915_v25, %v2493_v42 }
 0x3fb   :  { %v876_v58 = vpop.f32.mrf.mxu0  ;;  %v1759_v33 = vpop.f32.mrf.mxu1 }
 0x3fc   :  { %v921_v63 = vadd.f32 %v875_v4, %v2441_v39  ;;  %v877_v19 = vadd.f32 %v876_v58, %v2479_v15 }
 0x3fd   :  { %v878_v20 = vpop.f32.mrf.mxu0  ;;  %v918_v27 = vpop.f32.mrf.mxu1 }
 0x3fe   :  { %v1513_v29 = vmul.f32 -1.442695, %v921_v63  ;;  %v928_v35 = vadd.f32 %v877_v19, %v2443_v41 }
 0x3ff   :  { %v879_v3 = vpop.f32.mrf.mxu0  ;;  %v1760_v21 = vpop.f32.mrf.mxu1 }
 0x400   :  { %1934 = vpow2.f32 %v1513_v29  ;;  %v1514_v49 = vmul.f32 -1.442695, %v928_v35 }
 0x402   :  { %1936 = vpow2.f32 %v1514_v49 }
 0x40d   :  { %v1935_v26 = vpop.eup %1934 }
 0x40e   :  { %v925_v34 = vadd.f32 1.0, %v1935_v26 }
 0x40f   :  { %v1937_v31 = vpop.eup %1936 }
 0x410   :  { %1938 = vrcp.f32 %v925_v34  ;;  %v932_v28 = vadd.f32 1.0, %v1937_v31 }
 0x412   :  { %1940 = vrcp.f32 %v932_v28 }
 0x41d   :  { %v1939_v39 = vpop.eup %1938 }
 0x41e   :  { %v935_v32 = vmul.f32 %v1939_v39, %v916_v44 }
 0x41f   :  { %v1941_v43 = vpop.eup %1940 }
 0x420   :  { %v936_v37 = vadd.f32 %v935_v32, %v2457_v8  ;;  %v938_v36 = vsub.f32 1.0, %v1941_v43  ;;  %v940_v41 = vmul.f32 %v1941_v43, %v2589_v12 }
 0x422   :  { %1942 = vtanh.f32 %v936_v37 }
 0x42f   :  { %v1943_v24 = vpop.eup %1942 }
 0x430   :  { %v939_v30 = vmul.f32 %v1943_v24, %v938_v36  ;;  %v2688_v36 = vld [vmem:[%s2878_s3 + $0xa8] ss:$12 sps:$4 sm:$0xff]   ;;  %v2705_v24 = vld [vmem:[%s2878_s3 + $0x90] ss:$12 sps:$4 sm:$0xff]  }
 0x432   :  { %v2635_v4 = vadd.f32 %v940_v41, %v939_v30 }
 0x434   :  { %v945_v58 = vpack.c.bf16 %v2635_v4, %v2635_v4 }
 0x436   :  { %979 = vmatmul.mubr.bf16.vlgmr.msra.gmra.mxu0 %v945_v58  ;;  %1778 = vmatmul.mubr.bf16.vlgmr.msra.gmra.mxu1 %v945_v58 }
 0x437   :  { %1053 = vmatpush1.bf16.msra.mxu0 %v2192_v46  ;;  %1782 = vmatpush3.bf16.msra.mxu1 %v2266_v62 }
 0x438   :  { %1054 = vmatprep.subr.bf16.mxu0 %v2197_v47  ;;  %1783 = vmatprep.subr.bf16.mxu1 %v2896_v38 }
 0x439   :  { %1084 = vmatprep.mubr.bf16.mxu0 %v2897_v57  ;;  %1797 = vmatprep.mubr.msk.bf16.mxu1 %vm2010_vm0, %v2896_v38 }
 0x43b   :  { %1055 = vmatpush1.bf16.msra.mxu0 %v2209_v50  ;;  %1784 = vmatpush3.bf16.msra.mxu1 %v2289_v2 }
 0x43c   :  { %1056 = vmatprep.subr.bf16.mxu0 %v2220_v52  ;;  %1785 = vmatprep.subr.bf16.mxu1 %v2896_v38 }
 0x43f   :  { %1057 = vmatpush1.bf16.msra.mxu0 %v2233_v55  ;;  %1786 = vmatpush3.bf16.msra.mxu1 %v2312_v7 }
 0x440   :  { %1058 = vmatprep.subr.bf16.mxu0 %v2239_v56  ;;  %1787 = vmatprep.subr.bf16.mxu1 %v2896_v38 }
 0x443   :  { %1059 = vmatpush1.bf16.msra.mxu0 %v2252_v59  ;;  %1788 = vmatpush3.bf16.msra.mxu1 %v2335_v11 }
 0x444   :  { %1060 = vmatprep.subr.bf16.mxu0 %v2261_v61  ;;  %1789 = vmatprep.subr.bf16.mxu1 %v2896_v38 }
 0x447   :  { %1061 = vmatpush1.bf16.msra.mxu0 %v2276_v0  ;;  %1790 = vmatpush3.bf16.msra.mxu1 %v2353_v14 }
 0x448   :  { %1062 = vmatprep.subr.bf16.mxu0 %v2282_v1  ;;  %1791 = vmatprep.subr.bf16.mxu1 %v2896_v38 }
 0x44b   :  { %1063 = vmatpush1.bf16.msra.mxu0 %v2299_v5  ;;  %1792 = vmatpush3.bf16.msra.mxu1 %v2364_v16 }
 0x44c   :  { %1064 = vmatprep.subr.bf16.mxu0 %v2305_v6  ;;  %1793 = vmatprep.subr.bf16.mxu1 %v2896_v38 }
 0x44f   :  { %1065 = vmatpush1.bf16.msra.mxu0 %v2322_v9  ;;  %1794 = vmatpush3.bf16.msra.mxu1 %v2376_v17 }
 0x450   :  { %1066 = vmatprep.subr.bf16.mxu0 %v2328_v10  ;;  %1795 = vmatprep.subr.bf16.mxu1 %v2896_v38 }
 0x453   :  { %1067 = vmatpush1.bf16.msra.mxu0 %v2345_v13  ;;  %1796 = vmatpush3.bf16.msra.mxu1 %v2385_v18 }
 0x454   :  { %1158 = vmatprep.subr.bf16.mxu0 %v2187_v45  ;;  %1801 = vmatprep.subr.bf16.mxu1 %v2896_v38 }
 0x4f6   :  { %v980_v46 = vpop.f32.mrf.mxu0  ;;  %v1021_v47 = vpop.f32.mrf.mxu1 }
 0x4f7   :  { %v981_v50 = vadd.f32 %v980_v46, %v2471_v40  ;;  %v1022_v26 = vadd.f32 %v1021_v47, %v2493_v42 }
 0x4f8   :  { %v982_v52 = vpop.f32.mrf.mxu0  ;;  %v1779_v8 = vpop.f32.mrf.mxu1 }
 0x4f9   :  { %v1027_v12 = vadd.f32 %v981_v50, %v2448_v48  ;;  %v983_v20 = vadd.f32 %v982_v52, %v2479_v15 }
 0x4fa   :  { %v984_v25 = vpop.f32.mrf.mxu0  ;;  %v1024_v33 = vpop.f32.mrf.mxu1 }
 0x4fb   :  { %v1515_v63 = vmul.f32 -1.442695, %v1027_v12  ;;  %v1034_v45 = vadd.f32 %v983_v20, %v2450_v51  ;;  %v1990_v25 = vld [vmem:[%s2878_s3 + $0x98] ss:$12 sps:$4 sm:$0xff]   ;;  %v1994_v20 = vld [vmem:[%s2878_s3 + $0x60] ss:$12 sps:$4 sm:$0xff]  }
 0x4fc   :  { %v985_v27 = vpop.f32.mrf.mxu0  ;;  %v1780_v29 = vpop.f32.mrf.mxu1  ;;  %v1991_v33 = vld [vmem:[%s2878_s3 + $0x78] ss:$12 sps:$4 sm:$0xff]  }
 0x4fd   :  { %1944 = vpow2.f32 %v1515_v63  ;;  %v1516_v19 = vmul.f32 -1.442695, %v1034_v45  ;;  %v1993_v63 = vld [vmem:[%s2878_s3 + $0x64] ss:$12 sps:$4 sm:$0xff]   ;;  %v1995_v27 = vld [vmem:[%s2878_s3 + $0x68] ss:$12 sps:$4 sm:$0xff]  }
 0x4fe   :  { %v1996_v29 = vld [vmem:[%s2878_s3 + $0x4c] ss:$12 sps:$4 sm:$0xff]   ;;  %v1997_v45 = vld [vmem:[%s2878_s3 + $0x48] ss:$12 sps:$4 sm:$0xff]  }
 0x4ff   :  { %1946 = vpow2.f32 %v1516_v19  ;;  %v1998_v19 = vld [vmem:[%s2878_s3 + $0x50] ss:$12 sps:$4 sm:$0xff]  }
 0x50a   :  { %v1945_v3 = vpop.eup %1944 }
 0x50b   :  { %v1031_v21 = vadd.f32 1.0, %v1945_v3  ;;  %v1999_v3 = vld [vmem:[%s2878_s3 + $0x34] ss:$12 sps:$4 sm:$0xff]  }
 0x50c   :  { %v1947_v35 = vpop.eup %1946 }
 0x50d   :  { %1948 = vrcp.f32 %v1031_v21  ;;  %v1038_v49 = vadd.f32 1.0, %v1947_v35  ;;  %v2000_v21 = vld [vmem:[%s2878_s3 + $0x30] ss:$12 sps:$4 sm:$0xff]   ;;  %v2001_v35 = vld [vmem:[%s2878_s3 + $0x38] ss:$12 sps:$4 sm:$0xff]  }
 0x50f   :  { %1950 = vrcp.f32 %v1038_v49  ;;  %v2002_v49 = vld [vmem:[%s2878_s3 + $0x1c] ss:$12 sps:$4 sm:$0xff]  }
 0x51a   :  { %v1949_v48 = vpop.eup %1948 }
 0x51b   :  { %v1041_v34 = vmul.f32 %v1949_v48, %v1022_v26  ;;  %v2003_v26 = vld [vmem:[%s2878_s3 + $0x18] ss:$12 sps:$4 sm:$0xff]   ;;  %v2004_v48 = vld [vmem:[%s2878_s3 + $0x20] ss:$12 sps:$4 sm:$0xff]  }
 0x51c   :  { %v1951_v28 = vpop.eup %1950 }
 0x51d   :  { %v1042_v31 = vadd.f32 %v1041_v34, %v2482_v22  ;;  %v1044_v44 = vsub.f32 1.0, %v1951_v28  ;;  %v1046_v51 = vmul.f32 %v1951_v28, %v2635_v4  ;;  %v2695_v22 = vld [vmem:[%s2878_s3 + $0x94] ss:$12 sps:$4 sm:$0xff]   ;;  %v2005_v34 = vld [vmem:[%s2878_s3 + $0x4] ss:$12 sps:$4 sm:$0xff]  }
 0x51e   :  { %v2007_v28 = vld [vmem:[%s2878_s3 + $0x8] ss:$12 sps:$4 sm:$0xff]  }
 0x51f   :  { %1952 = vtanh.f32 %v1042_v31  ;;  %v2006_v31 = vld [vmem:[%s2878_s3] ss:$12 sps:$4 sm:$0xff]  }
 0x52c   :  { %v1953_v39 = vpop.eup %1952 }
 0x52d   :  { %v1045_v32 = vmul.f32 %v1953_v39, %v1044_v44 }
 0x52f   :  { %v2681_v37 = vadd.f32 %v1046_v51, %v1045_v32 }
 0x531   :  { %v1051_v43 = vpack.c.bf16 %v2681_v37, %v2681_v37 }
 0x533   :  { %1085 = vmatmul.mubr.bf16.vlgmr.msra.gmra.mxu0 %v1051_v43  ;;  %1798 = vmatmul.mubr.bf16.vlgmr.msra.gmra.mxu1 %v1051_v43  ;;  %v2898_v43 = vld [vmem:[#allocation3_spill] sm:$0xff] }
 0x534   :  { %1159 = vmatpush1.bf16.msra.mxu0 %v2688_v36  ;;  %1802 = vmatpush3.bf16.msra.mxu1 %v2266_v62  ;;  %v2712_v62 = vld [vmem:[%s2878_s3 + $0x7c] ss:$12 sps:$4 sm:$0xff]  }
 0x535   :  { %1160 = vmatprep.subr.bf16.mxu0 %v2695_v22  ;;  %1803 = vmatprep.subr.bf16.mxu1 %v2896_v38 }
 0x536   :  { %1190 = vmatprep.mubr.bf16.mxu0 %v2897_v57  ;;  %1817 = vmatprep.mubr.msk.bf16.mxu1 %vm2010_vm0, %v2896_v38 }
 0x538   :  { %1161 = vmatpush1.bf16.msra.mxu0 %v2705_v24  ;;  %1804 = vmatpush3.bf16.msra.mxu1 %v2289_v2 }
 0x539   :  { %1162 = vmatprep.subr.bf16.mxu0 %v2712_v62  ;;  %1805 = vmatprep.subr.bf16.mxu1 %v2896_v38 }
 0x53c   :  { %1163 = vmatpush1.bf16.msra.mxu0 %v2233_v55  ;;  %1806 = vmatpush3.bf16.msra.mxu1 %v2312_v7  ;;  %v1988_v55 = vld [vmem:[%s2878_s3 + $0xac] ss:$12 sps:$4 sm:$0xff]  }
 0x53d   :  { %1164 = vmatprep.subr.bf16.mxu0 %v2239_v56  ;;  %1807 = vmatprep.subr.bf16.mxu1 %v2896_v38 }
 0x540   :  { %1165 = vmatpush1.bf16.msra.mxu0 %v2252_v59  ;;  %1808 = vmatpush3.bf16.msra.mxu1 %v2335_v11 }
 0x541   :  { %1166 = vmatprep.subr.bf16.mxu0 %v2261_v61  ;;  %1809 = vmatprep.subr.bf16.mxu1 %v2896_v38 }
 0x544   :  { %1167 = vmatpush1.bf16.msra.mxu0 %v2276_v0  ;;  %1810 = vmatpush3.bf16.msra.mxu1 %v2353_v14 }
 0x545   :  { %1168 = vmatprep.subr.bf16.mxu0 %v2282_v1  ;;  %1811 = vmatprep.subr.bf16.mxu1 %v2896_v38 }
 0x548   :  { %1169 = vmatpush1.bf16.msra.mxu0 %v2299_v5  ;;  %1812 = vmatpush3.bf16.msra.mxu1 %v2364_v16 }
 0x549   :  { %1170 = vmatprep.subr.bf16.mxu0 %v2305_v6  ;;  %1813 = vmatprep.subr.bf16.mxu1 %v2896_v38 }
 0x54c   :  { %1171 = vmatpush1.bf16.msra.mxu0 %v2322_v9  ;;  %1814 = vmatpush3.bf16.msra.mxu1 %v2376_v17 }
 0x54d   :  { %1172 = vmatprep.subr.bf16.mxu0 %v2328_v10  ;;  %1815 = vmatprep.subr.bf16.mxu1 %v2896_v38 }
 0x550   :  { %1173 = vmatpush1.bf16.msra.mxu0 %v2345_v13  ;;  %1816 = vmatpush3.bf16.msra.mxu1 %v2385_v18 }
 0x551   :  { %1264 = vmatprep.subr.bf16.mxu0 %v1988_v55  ;;  %1821 = vmatprep.subr.bf16.mxu1 %v2896_v38 }
 0x5f3   :  { %v1086_v56 = vpop.f32.mrf.mxu0  ;;  %v1127_v59 = vpop.f32.mrf.mxu1 }
 0x5f4   :  { %v1087_v61 = vadd.f32 %v1086_v56, %v2471_v40  ;;  %v1128_v41 = vadd.f32 %v1127_v59, %v2493_v42 }
 0x5f5   :  { %v1088_v0 = vpop.f32.mrf.mxu0  ;;  %v1799_v1 = vpop.f32.mrf.mxu1 }
 0x5f6   :  { %v1133_v2 = vadd.f32 %v1087_v61, %v2452_v54  ;;  %v1089_v9 = vadd.f32 %v1088_v0, %v2479_v15  ;;  %v2899_v61 = vld [vmem:[#allocation4_spill] sm:$0xff] }
 0x5f7   :  { %v1090_v5 = vpop.f32.mrf.mxu0  ;;  %v1130_v6 = vpop.f32.mrf.mxu1 }
 0x5f8   :  { %v1517_v7 = vmul.f32 -1.442695, %v1133_v2  ;;  %v1140_v13 = vadd.f32 %v1089_v9, %v2454_v60 }
 0x5f9   :  { %v1091_v10 = vpop.f32.mrf.mxu0  ;;  %v1800_v11 = vpop.f32.mrf.mxu1 }
 0x5fa   :  { %1954 = vpow2.f32 %v1517_v7  ;;  %v1518_v14 = vmul.f32 -1.442695, %v1140_v13 }
 0x5fc   :  { %1956 = vpow2.f32 %v1518_v14 }
 0x607   :  { %v1955_v16 = vpop.eup %1954 }
 0x608   :  { %v1137_v17 = vadd.f32 1.0, %v1955_v16 }
 0x609   :  { %v1957_v18 = vpop.eup %1956 }
 0x60a   :  { %1958 = vrcp.f32 %v1137_v17  ;;  %v1144_v30 = vadd.f32 1.0, %v1957_v18 }
 0x60c   :  { %1960 = vrcp.f32 %v1144_v30 }
 0x617   :  { %v1959_v54 = vpop.eup %1958 }
 0x618   :  { %v1147_v4 = vmul.f32 %v1959_v54, %v1128_v41 }
 0x619   :  { %v1961_v46 = vpop.eup %1960 }
 0x61a   :  { %v1148_v58 = vadd.f32 %v1147_v4, %v2476_v53  ;;  %v1150_v47 = vsub.f32 1.0, %v1961_v46  ;;  %v1152_v60 = vmul.f32 %v1961_v46, %v2681_v37  ;;  %v1989_v53 = vld [vmem:[%s2878_s3 + $0xb0] ss:$12 sps:$4 sm:$0xff]   ;;  %v1899_v46 = vld [vmem:[%s2882_s5 + $0x20] sm:$0xff]  }
 0x61b   :  { %v1896_v4 = vld [vmem:[%s2882_s5 + $0x38] sm:$0xff]  }
 0x61c   :  { %1962 = vtanh.f32 %v1148_v58  ;;  %v1898_v58 = vld [vmem:[%s2882_s5 + $0x28] sm:$0xff]  }
 0x629   :  { %v1963_v50 = vpop.eup %1962 }
 0x62a   :  { %v1151_v52 = vmul.f32 %v1963_v50, %v1150_v47  ;;  %v1900_v47 = vld [vmem:[%s2882_s5 + $0x18] sm:$0xff]   ;;  %v1901_v50 = vld [vmem:[%s2882_s5 + $0x10] sm:$0xff]  }
 0x62c   :  { %v2749_v8 = vadd.f32 %v1152_v60, %v1151_v52  ;;  %v1902_v52 = vld [vmem:[%s2882_s5 + $0x8] sm:$0xff]   ;;  %v1903_v60 = vld [vmem:[%s2882_s5] sm:$0xff]  }
 0x62e   :  { %v1157_v12 = vpack.c.bf16 %v2749_v8, %v2749_v8 }
 0x630   :  { %1191 = vmatmul.mubr.bf16.vlgmr.msra.gmra.mxu0 %v1157_v12  ;;  %1818 = vmatmul.mubr.bf16.vlgmr.msra.gmra.mxu1 %v1157_v12 }
 0x631   :  { %1265 = vmatpush1.bf16.msra.mxu0 %v2688_v36  ;;  %1822 = vmatpush3.bf16.msra.mxu1 %v1989_v53 }
 0x632   :  { %1266 = vmatprep.subr.bf16.mxu0 %v2695_v22  ;;  %1823 = vmatprep.subr.bf16.mxu1 %v2896_v38 }
 0x633   :  { %1296 = vmatprep.mubr.bf16.mxu0 %v2897_v57  ;;  %1837 = vmatprep.mubr.msk.bf16.mxu1 %vm2010_vm0, %v2896_v38  ;;  %v1992_v57 = vld [vmem:[%s2878_s3 + $0x80] ss:$12 sps:$4 sm:$0xff]  }
 0x635   :  { %1267 = vmatpush1.bf16.msra.mxu0 %v2705_v24  ;;  %1824 = vmatpush3.bf16.msra.mxu1 %v1990_v25 }
 0x636   :  { %1268 = vmatprep.subr.bf16.mxu0 %v2712_v62  ;;  %1825 = vmatprep.subr.bf16.mxu1 %v2896_v38 }
 0x639   :  { %1269 = vmatpush1.bf16.msra.mxu0 %v1991_v33  ;;  %1826 = vmatpush3.bf16.msra.mxu1 %v1992_v57  ;;  %v2900_v57 = vld [vmem:[#allocation5_spill] sm:$0xff] }
 0x63a   :  { %1270 = vmatprep.subr.bf16.mxu0 %v1993_v63  ;;  %1827 = vmatprep.subr.bf16.mxu1 %v2896_v38 }
 0x63d   :  { %1271 = vmatpush1.bf16.msra.mxu0 %v1994_v20  ;;  %1828 = vmatpush3.bf16.msra.mxu1 %v1995_v27 }
 0x63e   :  { %1272 = vmatprep.subr.bf16.mxu0 %v1996_v29  ;;  %1829 = vmatprep.subr.bf16.mxu1 %v2896_v38 }
 0x641   :  { %1273 = vmatpush1.bf16.msra.mxu0 %v1997_v45  ;;  %1830 = vmatpush3.bf16.msra.mxu1 %v1998_v19 }
 0x642   :  { %1274 = vmatprep.subr.bf16.mxu0 %v1999_v3  ;;  %1831 = vmatprep.subr.bf16.mxu1 %v2896_v38 }
 0x645   :  { %1275 = vmatpush1.bf16.msra.mxu0 %v2000_v21  ;;  %1832 = vmatpush3.bf16.msra.mxu1 %v2001_v35  ;;  %v2901_v21 = vld [vmem:[#allocation6_spill] sm:$0xff] }
 0x646   :  { %1276 = vmatprep.subr.bf16.mxu0 %v2002_v49  ;;  %1833 = vmatprep.subr.bf16.mxu1 %v2896_v38 }
 0x649   :  { %1277 = vmatpush1.bf16.msra.mxu0 %v2003_v26  ;;  %1834 = vmatpush3.bf16.msra.mxu1 %v2004_v48 }
 0x64a   :  { %1278 = vmatprep.subr.bf16.mxu0 %v2005_v34  ;;  %1835 = vmatprep.subr.bf16.mxu1 %v2896_v38 }
 0x64d   :  { %1279 = vmatpush1.bf16.msra.mxu0 %v2006_v31  ;;  %1836 = vmatpush3.bf16.msra.mxu1 %v2007_v28 }
 0x64e   :  { %1841 = vmatprep.subr.bf16.mxu0 %v2896_v38 }
 0x6f0   :  { %v1192_v44 = vpop.f32.mrf.mxu0  ;;  %v1233_v39 = vpop.f32.mrf.mxu1 }
 0x6f1   :  { %v1193_v32 = vadd.f32 %v1192_v44, %v2471_v40  ;;  %v1234_v9 = vadd.f32 %v1233_v39, %v2493_v42  ;;  %v2902_v44 = vld [vmem:[#allocation7_spill] sm:$0xff] }
 0x6f2   :  { %v1194_v51 = vpop.f32.mrf.mxu0  ;;  %v1819_v37 = vpop.f32.mrf.mxu1 }
 0x6f3   :  { %v1239_v36 = vadd.f32 %v1193_v32, %v2898_v43  ;;  %v1195_v55 = vadd.f32 %v1194_v51, %v2479_v15 }
 0x6f4   :  { %v1196_v22 = vpop.f32.mrf.mxu0  ;;  %v1236_v24 = vpop.f32.mrf.mxu1 }
 0x6f5   :  { %v1519_v62 = vmul.f32 -1.442695, %v1239_v36  ;;  %v1246_v0 = vadd.f32 %v1195_v55, %v2899_v61  ;;  %v1523_v24 = vld [vmem:[%s2883_s6] ss:$0 sm:$0xff] }
 0x6f6   :  { %v1197_v56 = vpop.f32.mrf.mxu0  ;;  %v1820_v59 = vpop.f32.mrf.mxu1 }
 0x6f7   :  { %1964 = vpow2.f32 %v1519_v62  ;;  %v1520_v1 = vmul.f32 -1.442695, %v1246_v0 }
 0x6f9   :  { %1966 = vpow2.f32 %v1520_v1 }
 0x704   :  { %v1965_v2 = vpop.eup %1964 }
 0x705   :  { %v1243_v5 = vadd.f32 1.0, %v1965_v2 }
 0x706   :  { %v1967_v6 = vpop.eup %1966 }
 0x707   :  { %1968 = vrcp.f32 %v1243_v5  ;;  %v1250_v7 = vadd.f32 1.0, %v1967_v6 }
 0x709   :  { %1970 = vrcp.f32 %v1250_v7 }
 0x714   :  { %v1969_v10 = vpop.eup %1968 }
 0x715   :  { %v1253_v11 = vmul.f32 %v1969_v10, %v1234_v9 }
 0x716   :  { %v1971_v14 = vpop.eup %1970 }
 0x717   :  { %v1254_v13 = vadd.f32 %v1253_v11, %v2489_v23  ;;  %v1256_v16 = vsub.f32 1.0, %v1971_v14  ;;  %v1258_v30 = vmul.f32 %v1971_v14, %v2749_v8  ;;  %v1897_v23 = vld [vmem:[%s2882_s5 + $0x30] sm:$0xff]  }
 0x719   :  { %1972 = vtanh.f32 %v1254_v13 }
 0x726   :  { %v1973_v17 = vpop.eup %1972 }
 0x727   :  { %v1257_v18 = vmul.f32 %v1973_v17, %v1256_v16 }
 0x729   :  { %v1259_v41 = vadd.f32 %v1258_v30, %v1257_v18 }
 0x72b   :  { %v1263_v54 = vpack.c.bf16 %v1259_v41, %v1259_v41 }
 0x72d   :  { %1297 = vmatmul.mubr.bf16.vlgmr.msra.gmra.mxu0 %v1263_v54  ;;  %1838 = vmatmul.mubr.bf16.vlgmr.msra.gmra.mxu1 %v1263_v54 }
 0x72e   :  { %1857 = vmatprep.mubr.msk.bf16.mxu0 %vm2010_vm0, %v2896_v38  ;;  %1842 = vmatpush3.bf16.msra.mxu0 %v1896_v4 }
 0x72f   :  { %1843 = vmatprep.subr.bf16.mxu0 %v2896_v38 }
 0x732   :  { %1844 = vmatpush3.bf16.msra.mxu0 %v1897_v23 }
 0x733   :  { %1845 = vmatprep.subr.bf16.mxu0 %v2896_v38 }
 0x736   :  { %1846 = vmatpush3.bf16.msra.mxu0 %v1898_v58 }
 0x737   :  { %1847 = vmatprep.subr.bf16.mxu0 %v2896_v38 }
 0x73a   :  { %1848 = vmatpush3.bf16.msra.mxu0 %v1899_v46 }
 0x73b   :  { %1849 = vmatprep.subr.bf16.mxu0 %v2896_v38 }
 0x73e   :  { %1850 = vmatpush3.bf16.msra.mxu0 %v1900_v47 }
 0x73f   :  { %1851 = vmatprep.subr.bf16.mxu0 %v2896_v38 }
 0x742   :  { %1852 = vmatpush3.bf16.msra.mxu0 %v1901_v50 }
 0x743   :  { %1853 = vmatprep.subr.bf16.mxu0 %v2896_v38 }
 0x746   :  { %1854 = vmatpush3.bf16.msra.mxu0 %v1902_v52 }
 0x747   :  { %1855 = vmatprep.subr.bf16.mxu0 %v2896_v38 }
 0x74a   :  { %1856 = vmatpush3.bf16.msra.mxu0 %v1903_v60 }
 0x7ed   :  { %v1298_v8 = vpop.f32.mrf.mxu0  ;;  %v1339_v12 = vpop.f32.mrf.mxu1 }
 0x7ee   :  { %v1299_v53 = vadd.f32 %v1298_v8, %v2471_v40  ;;  %v1340_v34 = vadd.f32 %v1339_v12, %v2493_v42 }
 0x7ef   :  { %v1300_v25 = vpop.f32.mrf.mxu0  ;;  %v1839_v33 = vpop.f32.mrf.mxu1 }
 0x7f0   :  { %v1345_v63 = vadd.f32 %v1299_v53, %v2900_v57  ;;  %v1301_v45 = vadd.f32 %v1300_v25, %v2479_v15 }
 0x7f1   :  { %v1302_v20 = vpop.f32.mrf.mxu0  ;;  %v1342_v27 = vpop.f32.mrf.mxu1 }
 0x7f2   :  { %v1521_v29 = vmul.f32 -1.442695, %v1345_v63  ;;  %v1352_v35 = vadd.f32 %v1301_v45, %v2901_v21 }
 0x7f3   :  { %v1303_v19 = vpop.f32.mrf.mxu0  ;;  %v1840_v3 = vpop.f32.mrf.mxu1 }
 0x7f4   :  { %1974 = vpow2.f32 %v1521_v29  ;;  %v1522_v38 = vmul.f32 -1.442695, %v1352_v35 }
 0x7f6   :  { %1976 = vpow2.f32 %v1522_v38 }
 0x801   :  { %v1975_v49 = vpop.eup %1974 }
 0x802   :  { %v1349_v26 = vadd.f32 1.0, %v1975_v49 }
 0x803   :  { %v1977_v40 = vpop.eup %1976 }
 0x804   :  { %1978 = vrcp.f32 %v1349_v26  ;;  %v1356_v48 = vadd.f32 1.0, %v1977_v40 }
 0x806   :  { %1980 = vrcp.f32 %v1356_v48 }
 0x811   :  { %v1979_v31 = vpop.eup %1978 }
 0x812   :  { %v1359_v28 = vmul.f32 %v1979_v31, %v1340_v34 }
 0x813   :  { %v1981_v15 = vpop.eup %1980 }
 0x814   :  { %v1360_v39 = vadd.f32 %v1359_v28, %v2902_v44  ;;  %v1362_v32 = vsub.f32 1.0, %v1981_v15  ;;  %v1364_v43 = vmul.f32 %v1981_v15, %v1259_v41 }
 0x816   :  { %1982 = vtanh.f32 %v1360_v39 }
 0x823   :  { %v1983_v51 = vpop.eup %1982 }
 0x824   :  { %v1363_v37 = vmul.f32 %v1983_v51, %v1362_v32 }
 0x826   :  { %v1365_v36 = vadd.f32 %v1364_v43, %v1363_v37 }
 0x828   :  { %v1366_v22 = vpack.c.bf16 %v1365_v36, %v1365_v36 }
 0x82a   :  { %1858 = vmatmul.mubr.bf16.vlgmr.msra.gmra.mxu0 %v1366_v22 }
 0x8ea   :  { %v1472_v62 = vpop.f32.mrf.mxu0 }
 0x8eb   :  { %v1473_v42 = vadd.f32 %v1523_v24, %v1472_v62 }
 0x8ec   :  { %v1859_v55 = vpop.f32.mrf.mxu0 }
 0x8ed   :  { %1478 = vst [vmem:[%s2884_s7] sm:$0xff] %v1473_v42 }
 0x8ee   :  { %v1475_v56 = vpop.f32.mrf.mxu0 }
 0x8f0   :  { %v1860_v59 = vpop.f32.mrf.mxu0 }

</bundles_post_ra>
